<compile_context>
chip_gen: v5e
topology: v5e:2x2
jax: 0.10.0
libtpu: 0.0.40
codegen_flags: <defaults>
</compile_context>

<pallas_src>
import functools

import jax
import jax.numpy as jnp
from jax import lax
from jax.experimental import pallas as pl
from jax.experimental.pallas import tpu as pltpu


# --------------------------------------------------------------------------
# Kernel 1: fused Q/K/V projection, full-width (H, H) matmuls, head-split out.
# --------------------------------------------------------------------------
def qkv_proj_kernel(q_ref, k_ref, v_ref,
                    wq_ref, bq_ref, wk_ref, bk_ref, wv_ref, bv_ref,
                    qo_ref, ko_ref, vo_ref,
                    *, num_heads, head_dim):
    def project(x_ref, w_ref, b_ref, o_ref):
        # (TP, H) @ (H, H) on the MXU, f32 accumulation, f32 bias add.
        y = jnp.dot(x_ref[...], w_ref[...],
                    preferred_element_type=jnp.float32) + b_ref[...]
        yb = y.astype(o_ref.dtype)
        # Head split via static lane slices -> (nh, TP, head_dim) output block.
        for h in range(num_heads):
            o_ref[h] = yb[:, h * head_dim:(h + 1) * head_dim]

    project(q_ref, wq_ref, bq_ref, qo_ref)   # 1/scale pre-folded into wq, bq
    project(k_ref, wk_ref, bk_ref, ko_ref)
    project(v_ref, wv_ref, bv_ref, vo_ref)


# --------------------------------------------------------------------------
# Kernel 2: attention + fused output projection.  Grid = (B, S//TQ); all heads
# are processed per step (static loop), single full-K output projection.
# --------------------------------------------------------------------------
def attention_kernel(q_ref, k_ref, v_ref, wo_ref, bo_ref,
                     out_ref, attn_ref,
                     ctx_ref,
                     *, num_heads, head_dim):
    for h in range(num_heads):
        qh = q_ref[h]                      # (TQ, head_dim) bf16 (scale folded)
        kh = k_ref[h]                      # (S,  head_dim) bf16

        # Scores: contract on head_dim (last axis of both) -> no K transpose.
        energy = lax.dot_general(
            qh, kh, dimension_numbers=(((1,), (1,)), ((), ())),
            preferred_element_type=jnp.float32)           # (TQ, S) f32

        # Numerically-stable softmax in f32; exact division so the returned
        # attention map rows sum to 1 (matches torch.softmax semantics).
        m = jnp.max(energy, axis=-1, keepdims=True)
        e = jnp.exp(energy - m)
        attn = e / jnp.sum(e, axis=-1, keepdims=True)
        attn_ref[h] = attn                                 # f32 map output

        # Per-head context, written at a static column offset into the
        # (TQ, H) bf16 context scratch (no concat, no per-head accumulator).
        ctx = jnp.dot(attn.astype(v_ref.dtype), v_ref[h],
                      preferred_element_type=jnp.float32)  # (TQ, head_dim)
        ctx_ref[:, h * head_dim:(h + 1) * head_dim] = ctx.astype(ctx_ref.dtype)

    # One full-width output projection: (TQ, H) @ (H, H), K = H.
    out_ref[...] = (jnp.dot(ctx_ref[...], wo_ref[...],
                            preferred_element_type=jnp.float32)
                    + bo_ref[...]).astype(out_ref.dtype)


def _pick_tile(S):
    """Largest seq tile <= 256 that divides S (keeps sublane dim aligned)."""
    if S <= 256:
        return S
    for t in (256, 128, 64, 32, 16, 8):
        if S % t == 0:
            return t
    return S


def multi_head_attention(query, key, value, params, *, num_heads):
    """query/key/value: (B, S, H) float32. params: PyTorch-layout weights."""
    B, S, H = query.shape
    head_dim = H // num_heads
    inv_scale = 1.0 / float(head_dim) ** 0.5
    TP = _pick_tile(S)   # projection seq tile
    TQ = _pick_tile(S)   # attention q tile

    cdt = jnp.bfloat16   # MXU compute dtype (f32 accumulation everywhere)

    # PyTorch nn.Linear stores W as (out, in) and computes x @ W.T + b.
    # Pre-transpose once; fold 1/scale into the Q projection (free).
    wq = (params["wq"].T * inv_scale).astype(cdt)
    wk = params["wk"].T.astype(cdt)
    wv = params["wv"].T.astype(cdt)
    wo = params["wo"].T.astype(cdt)
    bq = (params["bq"] * inv_scale).reshape(1, H).astype(jnp.float32)
    bk = params["bk"].reshape(1, H).astype(jnp.float32)
    bv = params["bv"].reshape(1, H).astype(jnp.float32)
    bo = params["bo"].reshape(1, H).astype(jnp.float32)

    qb = query.astype(cdt)
    kb = key.astype(cdt)
    vb = value.astype(cdt)

    cparams = pltpu.CompilerParams(
        dimension_semantics=("parallel", "parallel"),
        vmem_limit_bytes=48 * 1024 * 1024)

    # ---------------- projection pass ----------------
    proj_kernel = functools.partial(qkv_proj_kernel,
                                    num_heads=num_heads, head_dim=head_dim)

    x_spec = pl.BlockSpec((pl.Squeezed(), TP, H), lambda b, sp: (b, sp, 0))
    w_spec = pl.BlockSpec((H, H), lambda b, sp: (0, 0))
    b_spec = pl.BlockSpec((1, H), lambda b, sp: (0, 0))
    head_out_spec = pl.BlockSpec(
        (pl.Squeezed(), num_heads, TP, head_dim), lambda b, sp: (b, 0, sp, 0))
    head_shape = jax.ShapeDtypeStruct((B, num_heads, S, head_dim), cdt)

    qp, kp, vp = pl.pallas_call(
        proj_kernel,
        out_shape=(head_shape, head_shape, head_shape),
        grid_spec=pltpu.PrefetchScalarGridSpec(
            num_scalar_prefetch=0,
            grid=(B, S // TP),
            in_specs=[x_spec, x_spec, x_spec,
                      w_spec, b_spec, w_spec, b_spec, w_spec, b_spec],
            out_specs=[head_out_spec, head_out_spec, head_out_spec],
        ),
        compiler_params=cparams,
    )(qb, kb, vb, wq, bq, wk, bk, wv, bv)

    # ---------------- attention + output projection pass ----------------
    attn_kernel = functools.partial(attention_kernel,
                                    num_heads=num_heads, head_dim=head_dim)

    q_spec = pl.BlockSpec((pl.Squeezed(), num_heads, TQ, head_dim),
                          lambda b, qt: (b, 0, qt, 0))
    kv_spec = pl.BlockSpec((pl.Squeezed(), num_heads, S, head_dim),
                           lambda b, qt: (b, 0, 0, 0))
    wo_spec = pl.BlockSpec((H, H), lambda b, qt: (0, 0))
    bo_spec = pl.BlockSpec((1, H), lambda b, qt: (0, 0))
    out_spec = pl.BlockSpec((pl.Squeezed(), TQ, H), lambda b, qt: (b, qt, 0))
    attn_spec = pl.BlockSpec((pl.Squeezed(), num_heads, TQ, S),
                             lambda b, qt: (b, 0, qt, 0))

    out, attn = pl.pallas_call(
        attn_kernel,
        out_shape=(
            jax.ShapeDtypeStruct((B, S, H), jnp.float32),
            jax.ShapeDtypeStruct((B, num_heads, S, S), jnp.float32),
        ),
        grid_spec=pltpu.PrefetchScalarGridSpec(
            num_scalar_prefetch=0,
            grid=(B, S // TQ),
            in_specs=[q_spec, kv_spec, kv_spec, wo_spec, bo_spec],
            out_specs=[out_spec, attn_spec],
            scratch_shapes=[pltpu.VMEM((TQ, H), cdt)],   # per-step context
        ),
        compiler_params=cparams,
    )(qp, kp, vp, wo, bo)
    return out, attn


def reference_mha(query, key, value, params, *, num_heads):
    """Pure-JAX f32 reference mirroring the PyTorch forward (eval dropout)."""
    B, S, H = query.shape
    head_dim = H // num_heads
    scale = float(head_dim) ** 0.5

    def lin(x, w, b):
        return x @ w.T + b

    Q = lin(query, params["wq"], params["bq"]).reshape(B, S, num_heads, head_dim)
    K = lin(key, params["wk"], params["bk"]).reshape(B, S, num_heads, head_dim)
    V = lin(value, params["wv"], params["bv"]).reshape(B, S, num_heads, head_dim)
    Q = Q.transpose(0, 2, 1, 3)
    K = K.transpose(0, 2, 1, 3)
    V = V.transpose(0, 2, 1, 3)
    energy = jnp.einsum("bhqd,bhkd->bhqk", Q, K) / scale
    attention = jax.nn.softmax(energy, axis=-1)
    x = jnp.einsum("bhqk,bhkd->bhqd", attention, V)
    x = x.transpose(0, 2, 1, 3).reshape(B, S, H)
    output = lin(x, params["wo"], params["bo"])
    return output, attention


if __name__ == "__main__":
    # hidden matches the module's hidden_size=256; small batch/seq keep it fast
    # while exercising lane/sublane-aligned shapes (S, H multiples of 128).
    B, S, H = 2, 128, 256
    NUM_HEADS = 4

    key0 = jax.random.PRNGKey(0)
    keys = jax.random.split(key0, 12)

    query = jax.random.normal(keys[0], (B, S, H), dtype=jnp.float32)
    key_t = jax.random.normal(keys[1], (B, S, H), dtype=jnp.float32)
    value = jax.random.normal(keys[2], (B, S, H), dtype=jnp.float32)

    # Deterministic params (PyTorch Linear shapes: W (out, in), b (out,)).
    init = 0.05
    params = {
        "wq": init * jax.random.normal(keys[3], (H, H), dtype=jnp.float32),
        "bq": init * jax.random.normal(keys[4], (H,), dtype=jnp.float32),
        "wk": init * jax.random.normal(keys[5], (H, H), dtype=jnp.float32),
        "bk": init * jax.random.normal(keys[6], (H,), dtype=jnp.float32),
        "wv": init * jax.random.normal(keys[7], (H, H), dtype=jnp.float32),
        "bv": init * jax.random.normal(keys[8], (H,), dtype=jnp.float32),
        "wo": init * jax.random.normal(keys[9], (H, H), dtype=jnp.float32),
        "bo": init * jax.random.normal(keys[10], (H,), dtype=jnp.float32),
    }

    out, attn = multi_head_attention(query, key_t, value, params,
                                     num_heads=NUM_HEADS)
    jax.block_until_ready((out, attn))

    ref_out, ref_attn = reference_mha(query, key_t, value, params,
                                      num_heads=NUM_HEADS)

    assert out.shape == (B, S, H)
    assert attn.shape == (B, NUM_HEADS, S, S)
    # Tolerances cover bf16 MXU inputs (f32 accumulation); softmax math and the
    # attention-map normalization are exact f32.
    assert jnp.allclose(out, ref_out, atol=5e-2, rtol=5e-2)
    assert jnp.allclose(attn, ref_attn, atol=3e-2, rtol=3e-2)

    print("KERNEL_OK")
</pallas_src>

<mosaic_0001>
module attributes {stable_mosaic.version = 11 : i64} {
  func.func @qkv_proj_kernel(%arg0: i32, %arg1: i32, %arg2: memref<1x128x256xbf16, #tpu.memory_space<vmem>>, %arg3: memref<1x128x256xbf16, #tpu.memory_space<vmem>>, %arg4: memref<1x128x256xbf16, #tpu.memory_space<vmem>>, %arg5: memref<256x256xbf16, #tpu.memory_space<vmem>>, %arg6: memref<1x256xf32, #tpu.memory_space<vmem>>, %arg7: memref<256x256xbf16, #tpu.memory_space<vmem>>, %arg8: memref<1x256xf32, #tpu.memory_space<vmem>>, %arg9: memref<256x256xbf16, #tpu.memory_space<vmem>>, %arg10: memref<1x256xf32, #tpu.memory_space<vmem>>, %arg11: memref<1x4x128x64xbf16, #tpu.memory_space<vmem>>, %arg12: memref<1x4x128x64xbf16, #tpu.memory_space<vmem>>, %arg13: memref<1x4x128x64xbf16, #tpu.memory_space<vmem>>) attributes {dimension_semantics = [#tpu.dimension_semantics<parallel>, #tpu.dimension_semantics<parallel>], iteration_bounds = array<i64: 2, 1>, scalar_prefetch = 0 : i64, scratch_operands = 0 : i64, tpu.core_type = #tpu.core_type<tc>, window_params = [{transform_indices = @transform_0, window_bounds = array<i64: 1, 128, 256>}, {transform_indices = @transform_1, window_bounds = array<i64: 1, 128, 256>}, {transform_indices = @transform_2, window_bounds = array<i64: 1, 128, 256>}, {pipeline_mode = #tpu.pipeline_mode<synchronous>, transform_indices = @transform_3, window_bounds = array<i64: 256, 256>}, {pipeline_mode = #tpu.pipeline_mode<synchronous>, transform_indices = @transform_4, window_bounds = array<i64: 1, 256>}, {pipeline_mode = #tpu.pipeline_mode<synchronous>, transform_indices = @transform_5, window_bounds = array<i64: 256, 256>}, {pipeline_mode = #tpu.pipeline_mode<synchronous>, transform_indices = @transform_6, window_bounds = array<i64: 1, 256>}, {pipeline_mode = #tpu.pipeline_mode<synchronous>, transform_indices = @transform_7, window_bounds = array<i64: 256, 256>}, {pipeline_mode = #tpu.pipeline_mode<synchronous>, transform_indices = @transform_8, window_bounds = array<i64: 1, 256>}, {transform_indices = @transform_9, window_bounds = array<i64: 1, 4, 128, 64>}, {transform_indices = @transform_10, window_bounds = array<i64: 1, 4, 128, 64>}, {transform_indices = @transform_11, window_bounds = array<i64: 1, 4, 128, 64>}]} {
    %c0 = arith.constant 0 : index
    %c0_0 = arith.constant 0 : index
    %c0_1 = arith.constant 0 : index
    %0 = vector.load %arg2[%c0, %c0_0, %c0_1] : memref<1x128x256xbf16, #tpu.memory_space<vmem>>, vector<1x128x256xbf16>
    %1 = vector.shape_cast %0 : vector<1x128x256xbf16> to vector<128x256xbf16>
    %c0_2 = arith.constant 0 : index
    %c0_3 = arith.constant 0 : index
    %2 = vector.load %arg5[%c0_2, %c0_3] : memref<256x256xbf16, #tpu.memory_space<vmem>>, vector<256x256xbf16>
    %cst = arith.constant dense<0.000000e+00> : vector<128x256xf32>
    %3 = tpu.matmul %1, %2, %cst {dimension_numbers = #tpu.dot_dimension_numbers<[1], [0], [0], [1], [0, 0, 1, 1], [], []>} : vector<128x256xbf16>, vector<256x256xbf16>, vector<128x256xf32> -> vector<128x256xf32>
    %c0_4 = arith.constant 0 : index
    %c0_5 = arith.constant 0 : index
    %4 = vector.load %arg6[%c0_4, %c0_5] : memref<1x256xf32, #tpu.memory_space<vmem>>, vector<1x256xf32>
    %5 = vector.broadcast %4 : vector<1x256xf32> to vector<128x256xf32>
    %6 = arith.addf %3, %5 : vector<128x256xf32>
    %7 = arith.truncf %6 : vector<128x256xf32> to vector<128x256xbf16>
    %8 = vector.extract_strided_slice %7 {offsets = [0, 0], sizes = [128, 64], strides = [1, 1]} : vector<128x256xbf16> to vector<128x64xbf16>
    %c0_6 = arith.constant 0 : index
    %c0_7 = arith.constant 0 : index
    %c0_8 = arith.constant 0 : index
    %c0_9 = arith.constant 0 : index
    %9 = vector.load %arg11[%c0_6, %c0_7, %c0_8, %c0_9] : memref<1x4x128x64xbf16, #tpu.memory_space<vmem>>, vector<1x1x128x64xbf16>
    %10 = vector.shape_cast %9 : vector<1x1x128x64xbf16> to vector<128x64xbf16>
    %11 = vector.shape_cast %8 : vector<128x64xbf16> to vector<1x1x128x64xbf16>
    tpu.vector_store %arg11[%c0_6, %c0_7, %c0_8, %c0_9], %11 {strides = array<i32>} : memref<1x4x128x64xbf16, #tpu.memory_space<vmem>>, vector<1x1x128x64xbf16>,
    %12 = vector.extract_strided_slice %7 {offsets = [0, 64], sizes = [128, 64], strides = [1, 1]} : vector<128x256xbf16> to vector<128x64xbf16>
    %c0_10 = arith.constant 0 : index
    %c1 = arith.constant 1 : index
    %c0_11 = arith.constant 0 : index
    %c0_12 = arith.constant 0 : index
    %13 = vector.load %arg11[%c0_10, %c1, %c0_11, %c0_12] : memref<1x4x128x64xbf16, #tpu.memory_space<vmem>>, vector<1x1x128x64xbf16>
    %14 = vector.shape_cast %13 : vector<1x1x128x64xbf16> to vector<128x64xbf16>
    %15 = vector.shape_cast %12 : vector<128x64xbf16> to vector<1x1x128x64xbf16>
    tpu.vector_store %arg11[%c0_10, %c1, %c0_11, %c0_12], %15 {strides = array<i32>} : memref<1x4x128x64xbf16, #tpu.memory_space<vmem>>, vector<1x1x128x64xbf16>,
    %16 = vector.extract_strided_slice %7 {offsets = [0, 128], sizes = [128, 64], strides = [1, 1]} : vector<128x256xbf16> to vector<128x64xbf16>
    %c0_13 = arith.constant 0 : index
    %c2 = arith.constant 2 : index
    %c0_14 = arith.constant 0 : index
    %c0_15 = arith.constant 0 : index
    %17 = vector.load %arg11[%c0_13, %c2, %c0_14, %c0_15] : memref<1x4x128x64xbf16, #tpu.memory_space<vmem>>, vector<1x1x128x64xbf16>
    %18 = vector.shape_cast %17 : vector<1x1x128x64xbf16> to vector<128x64xbf16>
    %19 = vector.shape_cast %16 : vector<128x64xbf16> to vector<1x1x128x64xbf16>
    tpu.vector_store %arg11[%c0_13, %c2, %c0_14, %c0_15], %19 {strides = array<i32>} : memref<1x4x128x64xbf16, #tpu.memory_space<vmem>>, vector<1x1x128x64xbf16>,
    %20 = vector.extract_strided_slice %7 {offsets = [0, 192], sizes = [128, 64], strides = [1, 1]} : vector<128x256xbf16> to vector<128x64xbf16>
    %c0_16 = arith.constant 0 : index
    %c3 = arith.constant 3 : index
    %c0_17 = arith.constant 0 : index
    %c0_18 = arith.constant 0 : index
    %21 = vector.load %arg11[%c0_16, %c3, %c0_17, %c0_18] : memref<1x4x128x64xbf16, #tpu.memory_space<vmem>>, vector<1x1x128x64xbf16>
    %22 = vector.shape_cast %21 : vector<1x1x128x64xbf16> to vector<128x64xbf16>
    %23 = vector.shape_cast %20 : vector<128x64xbf16> to vector<1x1x128x64xbf16>
    tpu.vector_store %arg11[%c0_16, %c3, %c0_17, %c0_18], %23 {strides = array<i32>} : memref<1x4x128x64xbf16, #tpu.memory_space<vmem>>, vector<1x1x128x64xbf16>,
    %c0_19 = arith.constant 0 : index
    %c0_20 = arith.constant 0 : index
    %c0_21 = arith.constant 0 : index
    %24 = vector.load %arg3[%c0_19, %c0_20, %c0_21] : memref<1x128x256xbf16, #tpu.memory_space<vmem>>, vector<1x128x256xbf16>
    %25 = vector.shape_cast %24 : vector<1x128x256xbf16> to vector<128x256xbf16>
    %c0_22 = arith.constant 0 : index
    %c0_23 = arith.constant 0 : index
    %26 = vector.load %arg7[%c0_22, %c0_23] : memref<256x256xbf16, #tpu.memory_space<vmem>>, vector<256x256xbf16>
    %cst_24 = arith.constant dense<0.000000e+00> : vector<128x256xf32>
    %27 = tpu.matmul %25, %26, %cst_24 {dimension_numbers = #tpu.dot_dimension_numbers<[1], [0], [0], [1], [0, 0, 1, 1], [], []>} : vector<128x256xbf16>, vector<256x256xbf16>, vector<128x256xf32> -> vector<128x256xf32>
    %c0_25 = arith.constant 0 : index
    %c0_26 = arith.constant 0 : index
    %28 = vector.load %arg8[%c0_25, %c0_26] : memref<1x256xf32, #tpu.memory_space<vmem>>, vector<1x256xf32>
    %29 = vector.broadcast %28 : vector<1x256xf32> to vector<128x256xf32>
    %30 = arith.addf %27, %29 : vector<128x256xf32>
    %31 = arith.truncf %30 : vector<128x256xf32> to vector<128x256xbf16>
    %32 = vector.extract_strided_slice %31 {offsets = [0, 0], sizes = [128, 64], strides = [1, 1]} : vector<128x256xbf16> to vector<128x64xbf16>
    %c0_27 = arith.constant 0 : index
    %c0_28 = arith.constant 0 : index
    %c0_29 = arith.constant 0 : index
    %c0_30 = arith.constant 0 : index
    %33 = vector.load %arg12[%c0_27, %c0_28, %c0_29, %c0_30] : memref<1x4x128x64xbf16, #tpu.memory_space<vmem>>, vector<1x1x128x64xbf16>
    %34 = vector.shape_cast %33 : vector<1x1x128x64xbf16> to vector<128x64xbf16>
    %35 = vector.shape_cast %32 : vector<128x64xbf16> to vector<1x1x128x64xbf16>
    tpu.vector_store %arg12[%c0_27, %c0_28, %c0_29, %c0_30], %35 {strides = array<i32>} : memref<1x4x128x64xbf16, #tpu.memory_space<vmem>>, vector<1x1x128x64xbf16>,
    %36 = vector.extract_strided_slice %31 {offsets = [0, 64], sizes = [128, 64], strides = [1, 1]} : vector<128x256xbf16> to vector<128x64xbf16>
    %c0_31 = arith.constant 0 : index
    %c1_32 = arith.constant 1 : index
    %c0_33 = arith.constant 0 : index
    %c0_34 = arith.constant 0 : index
    %37 = vector.load %arg12[%c0_31, %c1_32, %c0_33, %c0_34] : memref<1x4x128x64xbf16, #tpu.memory_space<vmem>>, vector<1x1x128x64xbf16>
    %38 = vector.shape_cast %37 : vector<1x1x128x64xbf16> to vector<128x64xbf16>
    %39 = vector.shape_cast %36 : vector<128x64xbf16> to vector<1x1x128x64xbf16>
    tpu.vector_store %arg12[%c0_31, %c1_32, %c0_33, %c0_34], %39 {strides = array<i32>} : memref<1x4x128x64xbf16, #tpu.memory_space<vmem>>, vector<1x1x128x64xbf16>,
    %40 = vector.extract_strided_slice %31 {offsets = [0, 128], sizes = [128, 64], strides = [1, 1]} : vector<128x256xbf16> to vector<128x64xbf16>
    %c0_35 = arith.constant 0 : index
    %c2_36 = arith.constant 2 : index
    %c0_37 = arith.constant 0 : index
    %c0_38 = arith.constant 0 : index
    %41 = vector.load %arg12[%c0_35, %c2_36, %c0_37, %c0_38] : memref<1x4x128x64xbf16, #tpu.memory_space<vmem>>, vector<1x1x128x64xbf16>
    %42 = vector.shape_cast %41 : vector<1x1x128x64xbf16> to vector<128x64xbf16>
    %43 = vector.shape_cast %40 : vector<128x64xbf16> to vector<1x1x128x64xbf16>
    tpu.vector_store %arg12[%c0_35, %c2_36, %c0_37, %c0_38], %43 {strides = array<i32>} : memref<1x4x128x64xbf16, #tpu.memory_space<vmem>>, vector<1x1x128x64xbf16>,
    %44 = vector.extract_strided_slice %31 {offsets = [0, 192], sizes = [128, 64], strides = [1, 1]} : vector<128x256xbf16> to vector<128x64xbf16>
    %c0_39 = arith.constant 0 : index
    %c3_40 = arith.constant 3 : index
    %c0_41 = arith.constant 0 : index
    %c0_42 = arith.constant 0 : index
    %45 = vector.load %arg12[%c0_39, %c3_40, %c0_41, %c0_42] : memref<1x4x128x64xbf16, #tpu.memory_space<vmem>>, vector<1x1x128x64xbf16>
    %46 = vector.shape_cast %45 : vector<1x1x128x64xbf16> to vector<128x64xbf16>
    %47 = vector.shape_cast %44 : vector<128x64xbf16> to vector<1x1x128x64xbf16>
    tpu.vector_store %arg12[%c0_39, %c3_40, %c0_41, %c0_42], %47 {strides = array<i32>} : memref<1x4x128x64xbf16, #tpu.memory_space<vmem>>, vector<1x1x128x64xbf16>,
    %c0_43 = arith.constant 0 : index
    %c0_44 = arith.constant 0 : index
    %c0_45 = arith.constant 0 : index
    %48 = vector.load %arg4[%c0_43, %c0_44, %c0_45] : memref<1x128x256xbf16, #tpu.memory_space<vmem>>, vector<1x128x256xbf16>
    %49 = vector.shape_cast %48 : vector<1x128x256xbf16> to vector<128x256xbf16>
    %c0_46 = arith.constant 0 : index
    %c0_47 = arith.constant 0 : index
    %50 = vector.load %arg9[%c0_46, %c0_47] : memref<256x256xbf16, #tpu.memory_space<vmem>>, vector<256x256xbf16>
    %cst_48 = arith.constant dense<0.000000e+00> : vector<128x256xf32>
    %51 = tpu.matmul %49, %50, %cst_48 {dimension_numbers = #tpu.dot_dimension_numbers<[1], [0], [0], [1], [0, 0, 1, 1], [], []>} : vector<128x256xbf16>, vector<256x256xbf16>, vector<128x256xf32> -> vector<128x256xf32>
    %c0_49 = arith.constant 0 : index
    %c0_50 = arith.constant 0 : index
    %52 = vector.load %arg10[%c0_49, %c0_50] : memref<1x256xf32, #tpu.memory_space<vmem>>, vector<1x256xf32>
    %53 = vector.broadcast %52 : vector<1x256xf32> to vector<128x256xf32>
    %54 = arith.addf %51, %53 : vector<128x256xf32>
    %55 = arith.truncf %54 : vector<128x256xf32> to vector<128x256xbf16>
    %56 = vector.extract_strided_slice %55 {offsets = [0, 0], sizes = [128, 64], strides = [1, 1]} : vector<128x256xbf16> to vector<128x64xbf16>
    %c0_51 = arith.constant 0 : index
    %c0_52 = arith.constant 0 : index
    %c0_53 = arith.constant 0 : index
    %c0_54 = arith.constant 0 : index
    %57 = vector.load %arg13[%c0_51, %c0_52, %c0_53, %c0_54] : memref<1x4x128x64xbf16, #tpu.memory_space<vmem>>, vector<1x1x128x64xbf16>
    %58 = vector.shape_cast %57 : vector<1x1x128x64xbf16> to vector<128x64xbf16>
    %59 = vector.shape_cast %56 : vector<128x64xbf16> to vector<1x1x128x64xbf16>
    tpu.vector_store %arg13[%c0_51, %c0_52, %c0_53, %c0_54], %59 {strides = array<i32>} : memref<1x4x128x64xbf16, #tpu.memory_space<vmem>>, vector<1x1x128x64xbf16>,
    %60 = vector.extract_strided_slice %55 {offsets = [0, 64], sizes = [128, 64], strides = [1, 1]} : vector<128x256xbf16> to vector<128x64xbf16>
    %c0_55 = arith.constant 0 : index
    %c1_56 = arith.constant 1 : index
    %c0_57 = arith.constant 0 : index
    %c0_58 = arith.constant 0 : index
    %61 = vector.load %arg13[%c0_55, %c1_56, %c0_57, %c0_58] : memref<1x4x128x64xbf16, #tpu.memory_space<vmem>>, vector<1x1x128x64xbf16>
    %62 = vector.shape_cast %61 : vector<1x1x128x64xbf16> to vector<128x64xbf16>
    %63 = vector.shape_cast %60 : vector<128x64xbf16> to vector<1x1x128x64xbf16>
    tpu.vector_store %arg13[%c0_55, %c1_56, %c0_57, %c0_58], %63 {strides = array<i32>} : memref<1x4x128x64xbf16, #tpu.memory_space<vmem>>, vector<1x1x128x64xbf16>,
    %64 = vector.extract_strided_slice %55 {offsets = [0, 128], sizes = [128, 64], strides = [1, 1]} : vector<128x256xbf16> to vector<128x64xbf16>
    %c0_59 = arith.constant 0 : index
    %c2_60 = arith.constant 2 : index
    %c0_61 = arith.constant 0 : index
    %c0_62 = arith.constant 0 : index
    %65 = vector.load %arg13[%c0_59, %c2_60, %c0_61, %c0_62] : memref<1x4x128x64xbf16, #tpu.memory_space<vmem>>, vector<1x1x128x64xbf16>
    %66 = vector.shape_cast %65 : vector<1x1x128x64xbf16> to vector<128x64xbf16>
    %67 = vector.shape_cast %64 : vector<128x64xbf16> to vector<1x1x128x64xbf16>
    tpu.vector_store %arg13[%c0_59, %c2_60, %c0_61, %c0_62], %67 {strides = array<i32>} : memref<1x4x128x64xbf16, #tpu.memory_space<vmem>>, vector<1x1x128x64xbf16>,
    %68 = vector.extract_strided_slice %55 {offsets = [0, 192], sizes = [128, 64], strides = [1, 1]} : vector<128x256xbf16> to vector<128x64xbf16>
    %c0_63 = arith.constant 0 : index
    %c3_64 = arith.constant 3 : index
    %c0_65 = arith.constant 0 : index
    %c0_66 = arith.constant 0 : index
    %69 = vector.load %arg13[%c0_63, %c3_64, %c0_65, %c0_66] : memref<1x4x128x64xbf16, #tpu.memory_space<vmem>>, vector<1x1x128x64xbf16>
    %70 = vector.shape_cast %69 : vector<1x1x128x64xbf16> to vector<128x64xbf16>
    %71 = vector.shape_cast %68 : vector<128x64xbf16> to vector<1x1x128x64xbf16>
    tpu.vector_store %arg13[%c0_63, %c3_64, %c0_65, %c0_66], %71 {strides = array<i32>} : memref<1x4x128x64xbf16, #tpu.memory_space<vmem>>, vector<1x1x128x64xbf16>,
    return
  }
  func.func @transform_0(%arg0: i32, %arg1: i32) -> (i32, i32, i32) {
    %c0_i32 = arith.constant 0 : i32
    %c0_i32_0 = arith.constant 0 : i32
    return %arg0, %arg1, %c0_i32 : i32, i32, i32
  }
  func.func @transform_1(%arg0: i32, %arg1: i32) -> (i32, i32, i32) {
    %c0_i32 = arith.constant 0 : i32
    %c0_i32_0 = arith.constant 0 : i32
    return %arg0, %arg1, %c0_i32 : i32, i32, i32
  }
  func.func @transform_2(%arg0: i32, %arg1: i32) -> (i32, i32, i32) {
    %c0_i32 = arith.constant 0 : i32
    %c0_i32_0 = arith.constant 0 : i32
    return %arg0, %arg1, %c0_i32 : i32, i32, i32
  }
  func.func @transform_3(%arg0: i32, %arg1: i32) -> (i32, i32) {
    %c0_i32 = arith.constant 0 : i32
    %c0_i32_0 = arith.constant 0 : i32
    %c0_i32_1 = arith.constant 0 : i32
    return %c0_i32, %c0_i32_0 : i32, i32
  }
  func.func @transform_4(%arg0: i32, %arg1: i32) -> (i32, i32) {
    %c0_i32 = arith.constant 0 : i32
    %c0_i32_0 = arith.constant 0 : i32
    %c0_i32_1 = arith.constant 0 : i32
    return %c0_i32, %c0_i32_0 : i32, i32
  }
  func.func @transform_5(%arg0: i32, %arg1: i32) -> (i32, i32) {
    %c0_i32 = arith.constant 0 : i32
    %c0_i32_0 = arith.constant 0 : i32
    %c0_i32_1 = arith.constant 0 : i32
    return %c0_i32, %c0_i32_0 : i32, i32
  }
  func.func @transform_6(%arg0: i32, %arg1: i32) -> (i32, i32) {
    %c0_i32 = arith.constant 0 : i32
    %c0_i32_0 = arith.constant 0 : i32
    %c0_i32_1 = arith.constant 0 : i32
    return %c0_i32, %c0_i32_0 : i32, i32
  }
  func.func @transform_7(%arg0: i32, %arg1: i32) -> (i32, i32) {
    %c0_i32 = arith.constant 0 : i32
    %c0_i32_0 = arith.constant 0 : i32
    %c0_i32_1 = arith.constant 0 : i32
    return %c0_i32, %c0_i32_0 : i32, i32
  }
  func.func @transform_8(%arg0: i32, %arg1: i32) -> (i32, i32) {
    %c0_i32 = arith.constant 0 : i32
    %c0_i32_0 = arith.constant 0 : i32
    %c0_i32_1 = arith.constant 0 : i32
    return %c0_i32, %c0_i32_0 : i32, i32
  }
  func.func @transform_9(%arg0: i32, %arg1: i32) -> (i32, i32, i32, i32) {
    %c0_i32 = arith.constant 0 : i32
    %c0_i32_0 = arith.constant 0 : i32
    %c0_i32_1 = arith.constant 0 : i32
    return %arg0, %c0_i32, %arg1, %c0_i32_0 : i32, i32, i32, i32
  }
  func.func @transform_10(%arg0: i32, %arg1: i32) -> (i32, i32, i32, i32) {
    %c0_i32 = arith.constant 0 : i32
    %c0_i32_0 = arith.constant 0 : i32
    %c0_i32_1 = arith.constant 0 : i32
    return %arg0, %c0_i32, %arg1, %c0_i32_0 : i32, i32, i32, i32
  }
  func.func @transform_11(%arg0: i32, %arg1: i32) -> (i32, i32, i32, i32) {
    %c0_i32 = arith.constant 0 : i32
    %c0_i32_0 = arith.constant 0 : i32
    %c0_i32_1 = arith.constant 0 : i32
    return %arg0, %c0_i32, %arg1, %c0_i32_0 : i32, i32, i32, i32
  }
}

</mosaic_0001>

<bundles_post_ra>
// kernel: tpu_custom_call.1
= control target key start
LH: loop header
LB: loop body
LE: loop exit
PB: predicated region body
PF: predicated region fallthrough
CT: control target
= control target key end

     0   :  { %s5169_s0 = inlined_call_operand.hbm [shape: bf16[2,128,256], index: 0, kind: input, shape index: {}]   ;;  %s5170_s1 = inlined_call_operand.hbm [shape: bf16[2,128,256], index: 1, kind: input, shape index: {}]   ;;  %s5171_s2 = inlined_call_operand.hbm [shape: bf16[2,128,256], index: 2, kind: input, shape index: {}]   ;;  %s5172_s3 = inlined_call_operand.hbm [shape: bf16[256,256], index: 3, kind: input, shape index: {}]   ;;  %s5173_s4 = inlined_call_operand.vmem [shape: f32[1,256], index: 4, kind: input, shape index: {}]   ;;  %s5174_s5 = inlined_call_operand.hbm [shape: bf16[256,256], index: 5, kind: input, shape index: {}]   ;;  %s5175_s6 = inlined_call_operand.vmem [shape: f32[1,256], index: 6, kind: input, shape index: {}]   ;;  %s5176_s7 = inlined_call_operand.hbm [shape: bf16[256,256], index: 7, kind: input, shape index: {}]   ;;  %s5177_s8 = inlined_call_operand.vmem [shape: f32[1,256], index: 8, kind: input, shape index: {}]   ;;  %s5178_s9 = inlined_call_operand.vmem [shape: bf16[2,4,128,64], index: 9, kind: output, shape index: {0}]   ;;  %s5179_s10 = inlined_call_operand.vmem [shape: bf16[2,4,128,64], index: 10, kind: output, shape index: {1}]   ;;  %s5180_s11 = inlined_call_operand.vmem [shape: bf16[2,4,128,64], index: 11, kind: output, shape index: {2}]  }
   0x1   :  { %5189 = sst [smem:[#allocation19_spill]] %s5169_s0 }
   0x2   :  { %5190 = sst [smem:[#allocation20_spill]] %s5170_s1 }
   0x3   :  { %5191 = sst [smem:[#allocation21_spill]] %s5172_s3 }
   0x4   :  { %5192 = sst [smem:[#allocation22_spill]] %s5174_s5 }
   0x5   :  { %5193 = sst [smem:[#allocation23_spill]] %s5175_s6 }
   0x6   :  { %5194 = sst [smem:[#allocation24_spill]] %s5177_s8 }
   0x7   :  { %5195 = sst [smem:[#allocation25_spill]] %s5179_s10 }
   0x8   :  { %5196 = sst [smem:[#allocation26_spill]] %s5180_s11 }
   0x9   :  { %17 = vsyncpa [#allocation3], 0 }
   0xa   :  { %19 = vsyncpa [#allocation3 + $0x1], 0 }
   0xb   :  { %20 = vsyncpa [#allocation5], 0 }
   0xc   :  { %22 = vsyncpa [#allocation5 + $0x1], 0 }
   0xd   :  { %23 = vsyncpa [#allocation8], 0 }
   0xe   :  { %24 = vsyncpa [#allocation11], 0  ;;  %s4315_s17 = smov 0   ;;  %s4317_s18 = smov 0  }
   0xf   :  { %s4319_s19 = smov 0   ;;  %s4321_s20 = smov 0  }
  0x10   :  { %s4323_s21 = smov 0   ;;  %s4325_s22 = smov 0  }
  0x11 LB: > { %5197 = sst [smem:[#allocation16_spill]] %s4243_s21  ;;  %s5181_s23 = sadd.s32 4294967295, %s4247_s22   ;;  %s4247_s22 = sphi %s4325_s22, %s30_s22   ;;  %s4243_s21 = sphi %s4323_s21, %s5219_s21   ;;  %s4239_s20 = sphi %s4321_s20, %s5218_s20   ;;  %s4235_s19 = sphi %s4319_s19, %s5222_s19   ;;  %s4231_s18 = sphi %s4317_s18, %s5221_s18   ;;  %s4227_s17 = sphi %s4315_s17, %s5220_s17  }
  0x12   : > { %p64_p0 = scmp.ne.s32.totalorder %s4231_s18, %s4227_s17  ;;  %p4347_p1 = scmp.eq.s32.totalorder %s5181_s23, 0 }
  0x13   : > { %p3007_p2 = scmp.ge.s32.totalorder %s4247_s22, 1  ;;  %p341_p3 = scmp.lt.s32.totalorder %s4247_s22, 3 }
  0x14   : > { %p4355_p4 = por %p4347_p1, %p64_p0  ;;  %s5200_s3 = sld [smem:[#allocation21_spill]] }
  0x15   : > { %p4362_p5 = pnand %p3007_p2, %p341_p3  ;;  %s4249_s30 = smov [#allocation7]  }
  0x16   : > { %s354_s12 = sshll.u32 %s4249_s30, 4  ;;  %s5182_s14 = smov 128   ;;  %s355_s12 = int_to_ptr.vmem [resolvable:$true] %s354_s12 }
  0x17   : > { %p3924_p6 = pneg %p4362_p5  ;;  %s5184_s15 = smov 8  }
  0x18   : > { %s42_s16 = sadd.s32 1, %s4243_s21  ;;  %s51_s17 = sadd.s32 1, %s4235_s19 }
  0x19   : > { %p4370_p7 = pnand %p3924_p6, %p4347_p1  ;;  %p44_p8 = scmp.ge.s32.totalorder %s42_s16, 2 }
  0x1a   : > { %s352_s28 = sshll.u32 %s5200_s3, 4  ;;  %p58_p9 = scmp.ne.s32.totalorder %s4235_s19, %s4231_s18  ;;  %s353_s28 = int_to_ptr.hbm [resolvable:$true] %s352_s28 }
  0x1b   : > { %3927 = dma.hbm_to_vmem [thread:$0]  (!%p4370_p7), %s353_s28, 4096, %s355_s12, [#allocation8], %s5182_s14, %s5182_s14, %s5184_s15  }
  0x1c   : > { %p59_p10 = scmp.eq.s32.totalorder %s4247_s22, 0  ;;  %s5224_s16 = smov (%p44_p8, %s42_s16), 0 }
  0x1d   : > { %5203 = sst [smem:[#allocation17_spill]] %s5224_s16  ;;  %p3947_p12 = scmp.lt.s32.totalorder %s4247_s22, 2 }
  0x1e   : > { %p60_p11 = por %p59_p10, %p58_p9  ;;  %s46_s26 = ssub.s32 %s4243_s21, %s5224_s16 }
  0x1f   : > { %s5187_s27 = sand.u32 1, %s4235_s19   ;;  %p49_p13 = scmp.eq.s32.totalorder %s46_s26, 0 }
  0x20   : > { %s4392_s30 = sshll.u32 %s5187_s27, 7  ;;  %s4395_s23 = sshll.u32 %s4243_s21, 7 }
  0x21   : > { %p4397_p0 = pnand %p3947_p12, %p60_p11  ;;  %s430_s14 = sand.u32 1, %s4247_s22  }
  0x22   : > { %s4402_s12 = scalar_select %p49_p13, %s4235_s19, %s51_s17  }
  0x23   : > { %s5206_s1 = sld [smem:[#allocation20_spill]]  ;;  %s434_s16 = scalar_lea.vmem [#allocation4], %s4392_s30 }
  0x24   : > { %5205 = sst [smem:[#allocation18_spill]] %s4402_s12  ;;  %s445_s27 = sshll.u32 %s434_s16, 4  ;;  %s446_s27 = int_to_ptr.vmem [resolvable:$true] %s445_s27 }
  0x25   : > { %s5207_s5 = sld [smem:[#allocation22_spill]]  ;;  %s4413_s17 = scalar_lea.sflag [#allocation5], %s430_s14 }
  0x26   : > { %s5208_s12 = smov 8   ;;  %s5209_s6 = smov 128  }
  0x27   : > { %s4252_s3 = smov [#allocation9]   ;;  %s4253_s8 = smov [#allocation10]  }
  0x28   : > { %s371_s15 = sshll.u32 %s4252_s3, 4  ;;  %s5210_s0 = sld [smem:[#allocation19_spill]]  ;;  %s372_s15 = int_to_ptr.vmem [resolvable:$true] %s371_s15 }
  0x29   : > { %s442_s26 = scalar_lea.hbm %s5206_s1, %s4395_s23  ;;  %s386_s1 = sshll.u32 %s5176_s7, 4  ;;  %s387_s1 = int_to_ptr.hbm [resolvable:$true] %s386_s1 }
  0x2a   : > { %s443_s11 = sshll.u32 %s442_s26, 4  ;;  %s409_s16 = scalar_lea.vmem [#allocation2], %s4392_s30  ;;  %s444_s11 = int_to_ptr.hbm [resolvable:$true] %s443_s11 }
  0x2b   : > { %s369_s10 = sshll.u32 %s5207_s5, 4  ;;  %s420_s26 = sshll.u32 %s409_s16, 4  ;;  %s370_s10 = int_to_ptr.hbm [resolvable:$true] %s369_s10  ;;  %s421_s26 = int_to_ptr.vmem [resolvable:$true] %s420_s26 }
  0x2c   : > { %3940 = dma.hbm_to_vmem [thread:$0]  (!%p4397_p0), %s444_s11, 2048, %s446_s27, %s4413_s17, %s5209_s6, %s5209_s6, %s5208_s12  }
  0x2d   : > { %3930 = dma.hbm_to_vmem [thread:$0]  (!%p4370_p7), %s370_s10, 4096, %s372_s15, [#allocation8], %s5209_s6, %s5209_s6, %s5208_s12  }
  0x2e   : > { %s388_s11 = sshll.u32 %s4253_s8, 4  ;;  %s417_s27 = scalar_lea.hbm %s5210_s0, %s4395_s23  ;;  %s389_s11 = int_to_ptr.vmem [resolvable:$true] %s388_s11 }
  0x2f   : > { %3933 = dma.hbm_to_vmem [thread:$0]  (!%p4370_p7), %s387_s1, 4096, %s389_s11, [#allocation11], %s5209_s6, %s5209_s6, %s5208_s12  }
  0x30   : > { %s418_s3 = sshll.u32 %s417_s27, 4  ;;  %s5211_s10 = sand.u32 1, %s4235_s19   ;;  %s419_s3 = int_to_ptr.hbm [resolvable:$true] %s418_s3 }
  0x31   : > { %s406_s15 = scalar_lea.sflag [#allocation3], %s5211_s10  ;;  %s467_s13 = scalar_lea.hbm %s5171_s2, %s4395_s23 }
  0x32   : > { %3937 = dma.hbm_to_vmem [thread:$0]  (!%p4397_p0), %s419_s3, 2048, %s421_s26, %s406_s15, %s5209_s6, %s5209_s6, %s5208_s12  }
  0x33   : > { %s468_s14 = sshll.u32 %s467_s13, 4  ;;  %s459_s0 = scalar_lea.vmem [#allocation6], %s4392_s30  ;;  %s469_s14 = int_to_ptr.hbm [resolvable:$true] %s468_s14 }
  0x34   : > { %s470_s5 = sshll.u32 %s459_s0, 4  ;;  %482 = sbr.rel (%p4362_p5) target bundleno = 726 (0x2d6), region = 56  ;;  %s471_s5 = int_to_ptr.vmem [resolvable:$true] %s470_s5 }
  0x35   : > { %3943 = dma.hbm_to_vmem [thread:$0]  (!%p4397_p0), %s469_s14, 2048, %s471_s5, %s4413_s17, %s5209_s6, %s5209_s6, %s5208_s12  }
  0x36   : > { %s484_s1 = sand.u32 (!%p4362_p5), 1, %s4231_s18  }
  0x37   : > { %s3022_s11 = sshll.u32 (!%p4362_p5), %s484_s1, 7  ;;  %s485_s27 = scalar_lea.sflag (!%p4362_p5), [#allocation3], %s484_s1 }
  0x38   : > { %s4460_s3 = scalar_lea.vmem (!%p4362_p5), [#allocation2], %s3022_s11 }
  0x39   : > { %4210 = dma.done.wait (%p4355_p4), %s485_s27, 2048  }
  0x3a   : > { %4212 = vsyncadd (%p4355_p4), %s485_s27, 4294965248  ;;  %s5212_s0 = sadd.s32 4294967295, %s4247_s22   ;;  %s4468_s6 = scalar_lea.vmem [#allocation4], %s3022_s11 }
  0x3b   : > { %s494_s23 = sand.u32 1, %s5212_s0  }
  0x3c   : > { %s495_s5 = scalar_lea.sflag [#allocation5], %s494_s23 }
  0x3d   : > { %4214 = dma.done.wait (%p4355_p4), %s495_s5, 4096  }
  0x3e   : > { %4216 = vsyncadd (%p4355_p4), %s495_s5, 4294963200  ;;  %s4474_s29 = scalar_lea.vmem [#allocation6], %s3022_s11 }
  0x3f   : > { %4218 = dma.done.wait (%p4347_p1), [#allocation8], 8192  }
  0x40   : > { %4220 = vsyncadd (%p4347_p1), [#allocation8], 4294959104 }
  0x41   : > { %4222 = dma.done.wait (%p4347_p1), [#allocation11], 4096  }
  0x42   : > { %4224 = vsyncadd (%p4347_p1), [#allocation11], 4294963200  ;;  %v3156_v0 = vld [vmem:[#allocation7 + $0x70] sm:$0xf]  ;;  %v3793_v1 = vld [vmem:[#allocation7 + $0x74] sm:$0xf0] }
  0x43   : > { %v3220_v2 = vld [vmem:[#allocation7 + $0xf0] sm:$0xf]  ;;  %v3157_v3 = vor.u32 %v3793_v1, %v3156_v0  ;;  %v3809_v4 = vld [vmem:[#allocation7 + $0xf4] sm:$0xf0]  ;;  %v3792_v5 = vld [vmem:[#allocation7 + $0x74] sm:$0xf] }
  0x44   : > { %v3158_v6 = vld [vmem:[#allocation7 + $0x78] sm:$0xf0]  ;;  %v3221_v7 = vor.u32 %v3809_v4, %v3220_v2  ;;  %v3808_v9 = vld [vmem:[#allocation7 + $0xf4] sm:$0xf]  ;;  %v3148_v11 = vld [vmem:[#allocation7 + $0x60] sm:$0xf] }
  0x45   : > { %v3161_v8 = vor.u32 %v3792_v5, %v3158_v6  ;;  %v3222_v10 = vld [vmem:[#allocation7 + $0xf8] sm:$0xf0]  ;;  %922 = vmatpush.bf16.msra.mxu0 %v3157_v3  ;;  %v3791_v13 = vld [vmem:[#allocation7 + $0x64] sm:$0xf0]  ;;  %v3212_v14 = vld [vmem:[#allocation7 + $0xe0] sm:$0xf] }
  0x46   : > { %v3225_v12 = vor.u32 %v3808_v9, %v3222_v10  ;;  %v3807_v15 = vld [vmem:[#allocation7 + $0xe4] sm:$0xf0]  ;;  %971 = vmatpush.bf16.msra.mxu1 %v3221_v7  ;;  %v3149_v16 = vor.u32 %v3791_v13, %v3148_v11  ;;  %v3790_v18 = vld [vmem:[#allocation7 + $0x64] sm:$0xf]  ;;  %v3150_v19 = vld [vmem:[#allocation7 + $0x68] sm:$0xf0] }
  0x47   : > { %1020 = vmatpush.bf16.msra.mxu2 %v3161_v8  ;;  %v3213_v17 = vor.u32 %v3807_v15, %v3212_v14  ;;  %v3806_v20 = vld [vmem:[#allocation7 + $0xe4] sm:$0xf]  ;;  %v3153_v21 = vor.u32 %v3790_v18, %v3150_v19  ;;  %v3214_v22 = vld [vmem:[#allocation7 + $0xe8] sm:$0xf0]  ;;  %v3140_v23 = vld [vmem:[#allocation7 + $0x50] sm:$0xf] }
  0x48   : > { %1069 = vmatpush.bf16.msra.mxu3 %v3225_v12  ;;  %v3789_v24 = vld [vmem:[#allocation7 + $0x54] sm:$0xf0]  ;;  %v3217_v25 = vor.u32 %v3806_v20, %v3214_v22  ;;  %v3204_v26 = vld [vmem:[#allocation7 + $0xd0] sm:$0xf]  ;;  %v3788_v28 = vld [vmem:[#allocation7 + $0x54] sm:$0xf] }
  0x49   : > { %v3805_v27 = vld [vmem:[#allocation7 + $0xd4] sm:$0xf0]  ;;  %923 = vmatpush.bf16.msra.mxu0 %v3149_v16  ;;  %v3141_v29 = vor.u32 %v3789_v24, %v3140_v23  ;;  %v3142_v30 = vld [vmem:[#allocation7 + $0x58] sm:$0xf0]  ;;  %v3804_v31 = vld [vmem:[#allocation7 + $0xd4] sm:$0xf] }
  0x4a   : > { %v3206_v32 = vld [vmem:[#allocation7 + $0xd8] sm:$0xf0]  ;;  %972 = vmatpush.bf16.msra.mxu1 %v3213_v17  ;;  %v3205_v33 = vor.u32 %v3805_v27, %v3204_v26  ;;  %v3145_v34 = vor.u32 %v3788_v28, %v3142_v30  ;;  %v3132_v35 = vld [vmem:[#allocation7 + $0x40] sm:$0xf]  ;;  %v3787_v36 = vld [vmem:[#allocation7 + $0x44] sm:$0xf0] }
  0x4b   : > { %1021 = vmatpush.bf16.msra.mxu2 %v3153_v21  ;;  %v3196_v37 = vld [vmem:[#allocation7 + $0xc0] sm:$0xf]  ;;  %v3209_v38 = vor.u32 %v3804_v31, %v3206_v32  ;;  %v3803_v39 = vld [vmem:[#allocation7 + $0xc4] sm:$0xf0]  ;;  %v3786_v40 = vld [vmem:[#allocation7 + $0x44] sm:$0xf]  ;;  %v3133_v44 = vor.u32 %v3787_v36, %v3132_v35 }
  0x4c   : > { %1070 = vmatpush.bf16.msra.mxu3 %v3217_v25  ;;  %v3134_v41 = vld [vmem:[#allocation7 + $0x48] sm:$0xf0]  ;;  %v3802_v42 = vld [vmem:[#allocation7 + $0xc4] sm:$0xf]  ;;  %v3197_v45 = vor.u32 %v3803_v39, %v3196_v37  ;;  %v3124_v47 = vld [vmem:[#allocation7 + $0x30] sm:$0xf] }
  0x4d   : > { %v3198_v43 = vld [vmem:[#allocation7 + $0xc8] sm:$0xf0]  ;;  %924 = vmatpush.bf16.msra.mxu0 %v3141_v29  ;;  %v3137_v46 = vor.u32 %v3786_v40, %v3134_v41  ;;  %v3785_v48 = vld [vmem:[#allocation7 + $0x34] sm:$0xf0]  ;;  %v3188_v49 = vld [vmem:[#allocation7 + $0xb0] sm:$0xf] }
  0x4e   : > { %973 = vmatpush.bf16.msra.mxu1 %v3205_v33  ;;  %v3201_v50 = vor.u32 %v3802_v42, %v3198_v43  ;;  %v3801_v51 = vld [vmem:[#allocation7 + $0xb4] sm:$0xf0]  ;;  %v3784_v52 = vld [vmem:[#allocation7 + $0x34] sm:$0xf]  ;;  %v3126_v53 = vld [vmem:[#allocation7 + $0x38] sm:$0xf0]  ;;  %v3125_v56 = vor.u32 %v3785_v48, %v3124_v47 }
  0x4f   : > { %1022 = vmatpush.bf16.msra.mxu2 %v3145_v34  ;;  %v3800_v54 = vld [vmem:[#allocation7 + $0xb4] sm:$0xf]  ;;  %v3190_v55 = vld [vmem:[#allocation7 + $0xb8] sm:$0xf0]  ;;  %v3189_v57 = vor.u32 %v3801_v51, %v3188_v49  ;;  %v3129_v58 = vor.u32 %v3784_v52, %v3126_v53  ;;  %v3116_v59 = vld [vmem:[#allocation7 + $0x20] sm:$0xf] }
  0x50   : > { %1071 = vmatpush.bf16.msra.mxu3 %v3209_v38  ;;  %v3783_v60 = vld [vmem:[#allocation7 + $0x24] sm:$0xf0]  ;;  %v3180_v61 = vld [vmem:[#allocation7 + $0xa0] sm:$0xf]  ;;  %v3193_v62 = vor.u32 %v3800_v54, %v3190_v55  ;;  %v3782_v0 = vld [vmem:[#allocation7 + $0x24] sm:$0xf] }
  0x51   : > { %925 = vmatpush.bf16.msra.mxu0 %v3133_v44  ;;  %v3799_v63 = vld [vmem:[#allocation7 + $0xa4] sm:$0xf0]  ;;  %v3118_v1 = vld [vmem:[#allocation7 + $0x28] sm:$0xf0]  ;;  %v3798_v2 = vld [vmem:[#allocation7 + $0xa4] sm:$0xf]  ;;  %v3117_v4 = vor.u32 %v3783_v60, %v3116_v59 }
  0x52   : > { %974 = vmatpush.bf16.msra.mxu1 %v3197_v45  ;;  %v3182_v3 = vld [vmem:[#allocation7 + $0xa8] sm:$0xf0]  ;;  %v3181_v5 = vor.u32 %v3799_v63, %v3180_v61  ;;  %v3121_v6 = vor.u32 %v3782_v0, %v3118_v1  ;;  %v3108_v7 = vld [vmem:[#allocation7 + $0x10] sm:$0xf]  ;;  %v3781_v8 = vld [vmem:[#allocation7 + $0x14] sm:$0xf0] }
  0x53   : > { %1023 = vmatpush.bf16.msra.mxu2 %v3137_v46  ;;  %v3172_v9 = vld [vmem:[#allocation7 + $0x90] sm:$0xf]  ;;  %v3185_v10 = vor.u32 %v3798_v2, %v3182_v3  ;;  %v3797_v11 = vld [vmem:[#allocation7 + $0x94] sm:$0xf0]  ;;  %v3780_v12 = vld [vmem:[#allocation7 + $0x14] sm:$0xf]  ;;  %v3109_v16 = vor.u32 %v3781_v8, %v3108_v7 }
  0x54   : > { %1072 = vmatpush.bf16.msra.mxu3 %v3201_v50  ;;  %v3110_v13 = vld [vmem:[#allocation7 + $0x18] sm:$0xf0]  ;;  %v3796_v14 = vld [vmem:[#allocation7 + $0x94] sm:$0xf]  ;;  %v3100_v17 = vld [vmem:[#allocation7] sm:$0xf]  ;;  %v3173_v19 = vor.u32 %v3797_v11, %v3172_v9 }
  0x55   : > { %926 = vmatpush.bf16.msra.mxu0 %v3125_v56  ;;  %v3174_v15 = vld [vmem:[#allocation7 + $0x98] sm:$0xf0]  ;;  %v3779_v18 = vld [vmem:[#allocation7 + $0x4] sm:$0xf0]  ;;  %v3113_v20 = vor.u32 %v3780_v12, %v3110_v13  ;;  %v3164_v21 = vld [vmem:[#allocation7 + $0x80] sm:$0xf] }
  0x56   : > { %975 = vmatpush.bf16.msra.mxu1 %v3189_v57  ;;  %v3795_v22 = vld [vmem:[#allocation7 + $0x84] sm:$0xf0]  ;;  %v3778_v23 = vld [vmem:[#allocation7 + $0x4] sm:$0xf]  ;;  %v3177_v24 = vor.u32 %v3796_v14, %v3174_v15  ;;  %v3102_v25 = vld [vmem:[#allocation7 + $0x8] sm:$0xf0]  ;;  %v3101_v31 = vor.u32 %v3779_v18, %v3100_v17 }
  0x57   : > { %1024 = vmatpush.bf16.msra.mxu2 %v3129_v58  ;;  %v3794_v26 = vld [vmem:[#allocation7 + $0x84] sm:$0xf]  ;;  %v3166_v27 = vld [vmem:[#allocation7 + $0x88] sm:$0xf0]  ;;  %v3036_v28 = vld [vmem:[%s4460_s3] sm:$0xf]  ;;  %v3165_v35 = vor.u32 %v3795_v22, %v3164_v21  ;;  %v3105_v36 = vor.u32 %v3778_v23, %v3102_v25 }
  0x58   : > { %1073 = vmatpush.bf16.msra.mxu3 %v3193_v62  ;;  %v3840_v29 = vld [vmem:[#allocation9 + $0x74] sm:$0xf]  ;;  %v3398_v30 = vld [vmem:[#allocation9 + $0x78] sm:$0xf0]  ;;  %v3763_v32 = vld [vmem:[%s4460_s3 + $0x4] sm:$0xf0]  ;;  %v3169_v39 = vor.u32 %v3794_v26, %v3166_v27 }
  0x59   : > { %927 = vmatpush.bf16.msra.mxu0 %v3117_v4  ;;  %v3856_v33 = vld [vmem:[#allocation9 + $0xf4] sm:$0xf]  ;;  %v3462_v34 = vld [vmem:[#allocation9 + $0xf8] sm:$0xf0]  ;;  %v3762_v37 = vld [vmem:[%s4460_s3 + $0x4] sm:$0xf]  ;;  %v3401_v40 = vor.u32 %v3840_v29, %v3398_v30  ;;  %v3037_v44 = vor.u32 %v3763_v32, %v3036_v28 }
  0x5a   : > { %976 = vmatpush.bf16.msra.mxu1 %v3181_v5  ;;  %v3038_v38 = vld [vmem:[%s4460_s3 + $0x8] sm:$0xf0]  ;;  %v3396_v41 = vld [vmem:[#allocation9 + $0x70] sm:$0xf]  ;;  %v3841_v42 = vld [vmem:[#allocation9 + $0x74] sm:$0xf0]  ;;  %v3465_v45 = vor.u32 %v3856_v33, %v3462_v34 }
  0x5b   : > { %1025 = vmatpush.bf16.msra.mxu2 %v3121_v6  ;;  %v3460_v43 = vld [vmem:[#allocation9 + $0xf0] sm:$0xf]  ;;  %v3857_v46 = vld [vmem:[#allocation9 + $0xf4] sm:$0xf0]  ;;  %v3838_v47 = vld [vmem:[#allocation9 + $0x64] sm:$0xf]  ;;  %v3041_v49 = vor.u32 %v3762_v37, %v3038_v38  ;;  %v3397_v52 = vor.u32 %v3841_v42, %v3396_v41 }
  0x5c   : > { %1074 = vmatpush.bf16.msra.mxu3 %v3185_v10  ;;  %v3390_v48 = vld [vmem:[#allocation9 + $0x68] sm:$0xf0]  ;;  %v3854_v50 = vld [vmem:[#allocation9 + $0xe4] sm:$0xf]  ;;  %v3461_v53 = vor.u32 %v3857_v46, %v3460_v43  ;;  %v3388_v55 = vld [vmem:[#allocation9 + $0x60] sm:$0xf] }
  0x5d   : > { %928 = vmatpush.bf16.msra.mxu0 %v3109_v16  ;;  %v3454_v51 = vld [vmem:[#allocation9 + $0xe8] sm:$0xf0]  ;;  %v3393_v54 = vor.u32 %v3838_v47, %v3390_v48  ;;  %v3839_v56 = vld [vmem:[#allocation9 + $0x64] sm:$0xf0]  ;;  %v3452_v58 = vld [vmem:[#allocation9 + $0xe0] sm:$0xf] }
  0x5e   : > { %977 = vmatpush.bf16.msra.mxu1 %v3173_v19  ;;  %v3457_v57 = vor.u32 %v3854_v50, %v3454_v51  ;;  %v3855_v59 = vld [vmem:[#allocation9 + $0xe4] sm:$0xf0]  ;;  %v3389_v60 = vor.u32 %v3839_v56, %v3388_v55  ;;  %v3836_v61 = vld [vmem:[#allocation9 + $0x54] sm:$0xf]  ;;  %v3382_v62 = vld [vmem:[#allocation9 + $0x58] sm:$0xf0] }
  0x5f   : > { %1026 = vmatpush.bf16.msra.mxu2 %v3113_v20  ;;  %v3852_v63 = vld [vmem:[#allocation9 + $0xd4] sm:$0xf]  ;;  %v3453_v0 = vor.u32 %v3855_v59, %v3452_v58  ;;  %v3385_v1 = vor.u32 %v3836_v61, %v3382_v62  ;;  %v3446_v2 = vld [vmem:[#allocation9 + $0xd8] sm:$0xf0]  ;;  %v3380_v3 = vld [vmem:[#allocation9 + $0x50] sm:$0xf] }
  0x60   : > { %1075 = vmatpush.bf16.msra.mxu3 %v3177_v24  ;;  %v3837_v4 = vld [vmem:[#allocation9 + $0x54] sm:$0xf0]  ;;  %v3449_v5 = vor.u32 %v3852_v63, %v3446_v2  ;;  %v3444_v6 = vld [vmem:[#allocation9 + $0xd0] sm:$0xf]  ;;  %v3764_v12 = vld [vmem:[%s4460_s3 + $0x14] sm:$0xf] }
  0x61   : > { %929 = vmatpush.bf16.msra.mxu0 %v3101_v31  ;;  %v3853_v7 = vld [vmem:[#allocation9 + $0xd4] sm:$0xf0]  ;;  %v3381_v8 = vor.u32 %v3837_v4, %v3380_v3  ;;  %v3044_v10 = vld [vmem:[%s4460_s3 + $0x10] sm:$0xf]  ;;  %v3046_v13 = vld [vmem:[%s4460_s3 + $0x18] sm:$0xf0] }
  0x62   : > { %978 = vmatpush.bf16.msra.mxu1 %v3165_v35  ;;  %v3445_v9 = vor.u32 %v3853_v7, %v3444_v6  ;;  %v3765_v11 = vld [vmem:[%s4460_s3 + $0x14] sm:$0xf0]  ;;  %v3049_v15 = vor.u32 %v3764_v12, %v3046_v13  ;;  %v3834_v16 = vld [vmem:[#allocation9 + $0x44] sm:$0xf]  ;;  %v3374_v17 = vld [vmem:[#allocation9 + $0x48] sm:$0xf0] }
  0x63   : > { %1027 = vmatpush.bf16.msra.mxu2 %v3105_v36  ;;  %v3045_v14 = vor.u32 %v3765_v11, %v3044_v10  ;;  %v3850_v18 = vld [vmem:[#allocation9 + $0xc4] sm:$0xf]  ;;  %v3377_v19 = vor.u32 %v3834_v16, %v3374_v17  ;;  %v3438_v20 = vld [vmem:[#allocation9 + $0xc8] sm:$0xf0]  ;;  %v3372_v21 = vld [vmem:[#allocation9 + $0x40] sm:$0xf] }
  0x64   : > { %1076 = vmatpush.bf16.msra.mxu3 %v3169_v39  ;;  %930 = vmatmul.bf16.vlgmr.msra.gmra.mxu0 %v3037_v44  ;;  %v3835_v22 = vld [vmem:[#allocation9 + $0x44] sm:$0xf0]  ;;  %v3441_v23 = vor.u32 %v3850_v18, %v3438_v20  ;;  %v3436_v25 = vld [vmem:[#allocation9 + $0xc0] sm:$0xf]  ;;  %v3766_v30 = vld [vmem:[%s4460_s3 + $0x24] sm:$0xf] }
  0x65   : > { %979 = vmatmul.bf16.vlgmr.msra.gmra.mxu1 %v3041_v49  ;;  %1624 = vmatpush.bf16.msrb.mxu0 %v3397_v52  ;;  %v3373_v24 = vor.u32 %v3835_v22, %v3372_v21  ;;  %v3851_v26 = vld [vmem:[#allocation9 + $0xc4] sm:$0xf0]  ;;  %v3052_v28 = vld [vmem:[%s4460_s3 + $0x20] sm:$0xf]  ;;  %v3054_v31 = vld [vmem:[%s4460_s3 + $0x28] sm:$0xf0] }
  0x66   : > { %1028 = vmatmul.bf16.vlgmr.msra.gmra.mxu2 %v3037_v44  ;;  %1673 = vmatpush.bf16.msrb.mxu1 %v3461_v53  ;;  %v3437_v27 = vor.u32 %v3851_v26, %v3436_v25  ;;  %v3767_v29 = vld [vmem:[%s4460_s3 + $0x24] sm:$0xf0]  ;;  %v3057_v33 = vor.u32 %v3766_v30, %v3054_v31  ;;  %v3832_v34 = vld [vmem:[#allocation9 + $0x34] sm:$0xf]  ;;  %v3366_v35 = vld [vmem:[#allocation9 + $0x38] sm:$0xf0] }
  0x67   : > { %1722 = vmatpush.bf16.msrb.mxu2 %v3401_v40  ;;  %1077 = vmatmul.bf16.vlgmr.msra.gmra.mxu3 %v3041_v49  ;;  %v3053_v32 = vor.u32 %v3767_v29, %v3052_v28  ;;  %v3848_v36 = vld [vmem:[#allocation9 + $0xb4] sm:$0xf]  ;;  %v3369_v37 = vor.u32 %v3832_v34, %v3366_v35  ;;  %v3430_v38 = vld [vmem:[#allocation9 + $0xb8] sm:$0xf0]  ;;  %v3364_v39 = vld [vmem:[#allocation9 + $0x30] sm:$0xf] }
  0x68   : > { %1771 = vmatpush.bf16.msrb.mxu3 %v3465_v45  ;;  %v3833_v40 = vld [vmem:[#allocation9 + $0x34] sm:$0xf0]  ;;  %v3433_v41 = vor.u32 %v3848_v36, %v3430_v38  ;;  %v3428_v43 = vld [vmem:[#allocation9 + $0xb0] sm:$0xf]  ;;  %v3768_v48 = vld [vmem:[%s4460_s3 + $0x34] sm:$0xf] }
  0x69   : > { %1625 = vmatpush.bf16.msrb.mxu0 %v3389_v60  ;;  %v3365_v42 = vor.u32 %v3833_v40, %v3364_v39  ;;  %v3849_v44 = vld [vmem:[#allocation9 + $0xb4] sm:$0xf0]  ;;  %v3060_v46 = vld [vmem:[%s4460_s3 + $0x30] sm:$0xf]  ;;  %v3062_v49 = vld [vmem:[%s4460_s3 + $0x38] sm:$0xf0] }
  0x6a   : > { %1674 = vmatpush.bf16.msrb.mxu1 %v3453_v0  ;;  %v3429_v45 = vor.u32 %v3849_v44, %v3428_v43  ;;  %v3769_v47 = vld [vmem:[%s4460_s3 + $0x34] sm:$0xf0]  ;;  %v3065_v51 = vor.u32 %v3768_v48, %v3062_v49  ;;  %v3830_v52 = vld [vmem:[#allocation9 + $0x24] sm:$0xf]  ;;  %v3358_v53 = vld [vmem:[#allocation9 + $0x28] sm:$0xf0] }
  0x6b   : > { %1723 = vmatpush.bf16.msrb.mxu2 %v3393_v54  ;;  %v3061_v50 = vor.u32 %v3769_v47, %v3060_v46  ;;  %v3846_v54 = vld [vmem:[#allocation9 + $0xa4] sm:$0xf]  ;;  %v3361_v55 = vor.u32 %v3830_v52, %v3358_v53  ;;  %v3422_v56 = vld [vmem:[#allocation9 + $0xa8] sm:$0xf0]  ;;  %v3831_v58 = vld [vmem:[#allocation9 + $0x24] sm:$0xf0] }
  0x6c   : > { %1772 = vmatpush.bf16.msrb.mxu3 %v3457_v57  ;;  %v3356_v57 = vld [vmem:[#allocation9 + $0x20] sm:$0xf]  ;;  %v3425_v59 = vor.u32 %v3846_v54, %v3422_v56  ;;  %v3847_v62 = vld [vmem:[#allocation9 + $0xa4] sm:$0xf0]  ;;  %v3770_v2 = vld [vmem:[%s4460_s3 + $0x44] sm:$0xf] }
  0x6d   : > { %1626 = vmatpush.bf16.msrb.mxu0 %v3381_v8  ;;  %v3357_v60 = vor.u32 %v3831_v58, %v3356_v57  ;;  %v3420_v61 = vld [vmem:[#allocation9 + $0xa0] sm:$0xf]  ;;  %v3070_v3 = vld [vmem:[%s4460_s3 + $0x48] sm:$0xf0]  ;;  %v3828_v6 = vld [vmem:[#allocation9 + $0x14] sm:$0xf] }
  0x6e   : > { %1675 = vmatpush.bf16.msrb.mxu1 %v3445_v9  ;;  %v3421_v63 = vor.u32 %v3847_v62, %v3420_v61  ;;  %v3068_v0 = vld [vmem:[%s4460_s3 + $0x40] sm:$0xf]  ;;  %v3350_v7 = vld [vmem:[#allocation9 + $0x18] sm:$0xf0]  ;;  %v3844_v8 = vld [vmem:[#allocation9 + $0x94] sm:$0xf] }
  0x6f   : > { %1724 = vmatpush.bf16.msrb.mxu2 %v3385_v1  ;;  %v3771_v1 = vld [vmem:[%s4460_s3 + $0x44] sm:$0xf0]  ;;  %v3353_v9 = vor.u32 %v3828_v6, %v3350_v7  ;;  %v3414_v10 = vld [vmem:[#allocation9 + $0x98] sm:$0xf0]  ;;  %v3348_v11 = vld [vmem:[#allocation9 + $0x10] sm:$0xf] }
  0x70   : > { %1773 = vmatpush.bf16.msrb.mxu3 %v3449_v5  ;;  %v3069_v4 = vor.u32 %v3771_v1, %v3068_v0  ;;  %v3073_v5 = vor.u32 %v3770_v2, %v3070_v3  ;;  %v3829_v12 = vld [vmem:[#allocation9 + $0x14] sm:$0xf0]  ;;  %v3417_v13 = vor.u32 %v3844_v8, %v3414_v10  ;;  %v3076_v18 = vld [vmem:[%s4460_s3 + $0x50] sm:$0xf]  ;;  %v3772_v20 = vld [vmem:[%s4460_s3 + $0x54] sm:$0xf] }
  0x71   : > { %1627 = vmatpush.bf16.msrb.mxu0 %v3373_v24  ;;  %v3845_v16 = vld [vmem:[#allocation9 + $0x94] sm:$0xf0]  ;;  %v3078_v21 = vld [vmem:[%s4460_s3 + $0x58] sm:$0xf0]  ;;  %v3826_v24 = vld [vmem:[#allocation9 + $0x4] sm:$0xf] }
  0x72   : > { %1676 = vmatpush.bf16.msrb.mxu1 %v3437_v27  ;;  %v3342_v25 = vld [vmem:[#allocation9 + $0x8] sm:$0xf0]  ;;  %v3842_v26 = vld [vmem:[#allocation9 + $0x84] sm:$0xf]  ;;  %v3340_v29 = vld [vmem:[#allocation9] sm:$0xf] }
  0x73   : > { %1725 = vmatpush.bf16.msrb.mxu2 %v3377_v19  ;;  %v3773_v19 = vld [vmem:[%s4460_s3 + $0x54] sm:$0xf0]  ;;  %v3345_v27 = vor.u32 %v3826_v24, %v3342_v25  ;;  %v3406_v28 = vld [vmem:[#allocation9 + $0x88] sm:$0xf0]  ;;  %v3827_v30 = vld [vmem:[#allocation9 + $0x4] sm:$0xf0] }
  0x74   : > { %935 = vmatmul.bf16.gmra.mxu0 %v3045_v14  ;;  %1774 = vmatpush.bf16.msrb.mxu3 %v3441_v23  ;;  %v3077_v22 = vor.u32 %v3773_v19, %v3076_v18  ;;  %v3081_v23 = vor.u32 %v3772_v20, %v3078_v21  ;;  %v3409_v31 = vor.u32 %v3842_v26, %v3406_v28  ;;  %v3843_v34 = vld [vmem:[#allocation9 + $0x84] sm:$0xf0]  ;;  %v3084_v36 = vld [vmem:[%s4460_s3 + $0x60] sm:$0xf]  ;;  %v3774_v38 = vld [vmem:[%s4460_s3 + $0x64] sm:$0xf] }
  0x75   : > { %984 = vmatmul.bf16.gmra.mxu1 %v3049_v15  ;;  %1628 = vmatpush.bf16.msrb.mxu0 %v3365_v42  ;;  %v3086_v39 = vld [vmem:[%s4460_s3 + $0x68] sm:$0xf0]  ;;  %v3888_v42 = vld [vmem:[#allocation10 + $0x74] sm:$0xf]  ;;  %v3638_v43 = vld [vmem:[#allocation10 + $0x78] sm:$0xf0] }
  0x76   : > { %1033 = vmatmul.bf16.gmra.mxu2 %v3045_v14  ;;  %1677 = vmatpush.bf16.msrb.mxu1 %v3429_v45  ;;  %v3349_v14 = vor.u32 %v3829_v12, %v3348_v11  ;;  %v3904_v44 = vld [vmem:[#allocation10 + $0xf4] sm:$0xf]  ;;  %v3641_v45 = vor.u32 %v3888_v42, %v3638_v43  ;;  %v3702_v46 = vld [vmem:[#allocation10 + $0xf8] sm:$0xf0]  ;;  %v3092_v48 = vld [vmem:[%s4460_s3 + $0x70] sm:$0xf] }
  0x77   : > { %1082 = vmatmul.bf16.gmra.mxu3 %v3049_v15  ;;  %1726 = vmatpush.bf16.msrb.mxu2 %v3369_v37  ;;  %v3412_v15 = vld [vmem:[#allocation9 + $0x90] sm:$0xf]  ;;  %v3775_v37 = vld [vmem:[%s4460_s3 + $0x64] sm:$0xf0]  ;;  %v3705_v47 = vor.u32 %v3904_v44, %v3702_v46  ;;  %v3777_v49 = vld [vmem:[%s4460_s3 + $0x74] sm:$0xf0] }
  0x78   : > { %1775 = vmatpush.bf16.msrb.mxu3 %v3433_v41  ;;  %v3413_v17 = vor.u32 %v3845_v16, %v3412_v15  ;;  %v3085_v40 = vor.u32 %v3775_v37, %v3084_v36  ;;  %v3089_v41 = vor.u32 %v3774_v38, %v3086_v39  ;;  %v3093_v52 = vor.u32 %v3777_v49, %v3092_v48  ;;  %v3636_v54 = vld [vmem:[#allocation10 + $0x70] sm:$0xf]  ;;  %v3905_v58 = vld [vmem:[#allocation10 + $0xf4] sm:$0xf0]  ;;  %v3630_v61 = vld [vmem:[#allocation10 + $0x68] sm:$0xf0] }
  0x79   : > { %1629 = vmatpush.bf16.msrb.mxu0 %v3357_v60  ;;  %v3700_v56 = vld [vmem:[#allocation10 + $0xf0] sm:$0xf]  ;;  %v3886_v60 = vld [vmem:[#allocation10 + $0x64] sm:$0xf]  ;;  %v3694_v0 = vld [vmem:[#allocation10 + $0xe8] sm:$0xf0] }
  0x7a   : > { %1678 = vmatpush.bf16.msrb.mxu1 %v3421_v63  ;;  %v3902_v62 = vld [vmem:[#allocation10 + $0xe4] sm:$0xf]  ;;  %v3633_v63 = vor.u32 %v3886_v60, %v3630_v61  ;;  %v676_v2 = vld [vmem:[%s5173_s4] sm:$0x3]  ;;  %v3278_v6 = vld [vmem:[%s4468_s6 + $0x8] sm:$0xf0] }
  0x7b   : > { %1727 = vmatpush.bf16.msrb.mxu2 %v3361_v55  ;;  %v3889_v55 = vld [vmem:[#allocation10 + $0x74] sm:$0xf0]  ;;  %v3697_v1 = vor.u32 %v3902_v62, %v3694_v0  ;;  %v3276_v3 = vld [vmem:[%s4468_s6] sm:$0xf]  ;;  %v4523_v7 = vperm.slane %v676_v2, 0  ;;  %p599_p1 = scmp.lt.s32.totalorder %s4239_s20, 1 }
  0x7c   : > { %1776 = vmatpush.bf16.msrb.mxu3 %v3425_v59  ;;  %v3637_v57 = vor.u32 %v3889_v55, %v3636_v54  ;;  %v3701_v59 = vor.u32 %v3905_v58, %v3700_v56  ;;  %v3628_v11 = vld [vmem:[#allocation10 + $0x60] sm:$0xf]  ;;  %v3887_v12 = vld [vmem:[#allocation10 + $0x64] sm:$0xf0]  ;;  %v4528_v19 = vperm.slane %v676_v2, 1  ;;  %vm1134_vm0 = vcmask 519168  }
  0x7d   : > { %1630 = vmatpush.bf16.msrb.mxu0 %v3349_v14  ;;  %v3629_v15 = vor.u32 %v3887_v12, %v3628_v11  ;;  %v3903_v16 = vld [vmem:[#allocation10 + $0xe4] sm:$0xf0]  ;;  %s5226_s20 = smov (!%p599_p1, %s4239_s20), 1  ;;  %v3884_v25 = vld [vmem:[#allocation10 + $0x54] sm:$0xf]  ;;  %s4254_s17 = smov 64  }
  0x7e   : > { %1679 = vmatpush.bf16.msrb.mxu1 %v3413_v17  ;;  %s4530_s30 = sshll.u32 %s5226_s20, 8  ;;  %v3622_v26 = vld [vmem:[#allocation10 + $0x58] sm:$0xf0]  ;;  %v3812_v36 = vld [vmem:[%s4468_s6 + $0x14] sm:$0xf]  ;;  %s5213_s10 = sld [smem:[#allocation23_spill]] }
  0x7f   : > { %1728 = vmatpush.bf16.msrb.mxu2 %v3353_v9  ;;  %s4537_s12 = scalar_lea.vmem %s5178_s9, %s4530_s30  ;;  %v3286_v37 = vld [vmem:[%s4468_s6 + $0x18] sm:$0xf0]  ;;  %v3620_v46 = vld [vmem:[#allocation10 + $0x50] sm:$0xf]  ;;  %v3614_v0 = vld [vmem:[#allocation10 + $0x48] sm:$0xf0] }
  0x80   : > { %1777 = vmatpush.bf16.msrb.mxu3 %v3417_v13  ;;  %v3692_v13 = vld [vmem:[#allocation10 + $0xe0] sm:$0xf]  ;;  %v3814_v11 = vld [vmem:[%s4468_s6 + $0x24] sm:$0xf]  ;;  %v3294_v12 = vld [vmem:[%s4468_s6 + $0x28] sm:$0xf0] }
  0x81   : > { %v3693_v17 = vor.u32 %v3903_v16, %v3692_v13  ;;  %s5214_s21 = sld [smem:[#allocation25_spill]] }
  0x82   : > { %s5215_s11 = sld [smem:[#allocation24_spill]] }
  0x83   : > { %1729 = vmatpush.bf16.msrb.mxu2 %v3345_v27  ;;  %v3900_v27 = vld [vmem:[#allocation10 + $0xd4] sm:$0xf]  ;;  %s5216_s0 = sld [smem:[#allocation26_spill]] }
  0x84   : > { %940 = vmatmul.bf16.gmra.mxu0 %v3053_v32  ;;  %1778 = vmatpush.bf16.msrb.mxu3 %v3409_v31 }
  0x85   : > { %989 = vmatmul.bf16.gmra.mxu1 %v3057_v33 }
  0x86   : > { %1038 = vmatmul.bf16.gmra.mxu2 %v3053_v32  ;;  %v3341_v32 = vor.u32 %v3827_v30, %v3340_v29  ;;  %v3625_v29 = vor.u32 %v3884_v25, %v3622_v26  ;;  %v3686_v30 = vld [vmem:[#allocation10 + $0xd8] sm:$0xf0]  ;;  %v3676_v26 = vld [vmem:[#allocation10 + $0xc0] sm:$0xf] }
  0x87   : > { %1087 = vmatmul.bf16.gmra.mxu3 %v3057_v33  ;;  %v3404_v33 = vld [vmem:[#allocation9 + $0x80] sm:$0xf]  ;;  %2423 = vmatpush.bf16.msra.mxu2 %v3641_v45  ;;  %v3289_v45 = vor.u32 %v3812_v36, %v3286_v37  ;;  %s4702_s13 = scalar_lea.vmem %s5214_s21, %s4530_s30 }
  0x88   : > { %v3405_v35 = vor.u32 %v3843_v34, %v3404_v33  ;;  %1631 = vmatpush.bf16.msrb.mxu0 %v3341_v32  ;;  %2472 = vmatpush.bf16.msra.mxu3 %v3705_v47  ;;  %v3689_v32 = vor.u32 %v3900_v27, %v3686_v30  ;;  %v3284_v34 = vld [vmem:[%s4468_s6 + $0x10] sm:$0xf]  ;;  %v3885_v47 = vld [vmem:[#allocation10 + $0x54] sm:$0xf0]  ;;  %v3899_v27 = vld [vmem:[#allocation10 + $0xc4] sm:$0xf0] }
  0x89   : > { %v3621_v49 = vor.u32 %v3885_v47, %v3620_v46  ;;  %v3677_v30 = vor.u32 %v3899_v27, %v3676_v26  ;;  %v3818_v26 = vld [vmem:[%s4468_s6 + $0x44] sm:$0xf]  ;;  %v3310_v27 = vld [vmem:[%s4468_s6 + $0x48] sm:$0xf0]  ;;  %s4921_s23 = scalar_lea.vmem %s5216_s0, %s4530_s30 }
  0x8a   : > { %1680 = vmatpush.bf16.msrb.mxu1 %v3405_v35  ;;  %v3813_v35 = vld [vmem:[%s4468_s6 + $0x14] sm:$0xf0] }
  0x8b   : > { %2424 = vmatpush.bf16.msra.mxu2 %v3633_v63  ;;  %v3882_v63 = vld [vmem:[#allocation10 + $0x44] sm:$0xf] }
  0x8c   : > { %2325 = vmatpush.bf16.msra.mxu0 %v3637_v57  ;;  %2473 = vmatpush.bf16.msra.mxu3 %v3697_v1  ;;  %v3617_v2 = vor.u32 %v3882_v63, %v3614_v0  ;;  %v3668_v0 = vld [vmem:[#allocation10 + $0xb0] sm:$0xf] }
  0x8e   : > { %2374 = vmatpush.bf16.msra.mxu1 %v3701_v59 }
  0x8f   : > { %2425 = vmatpush.bf16.msra.mxu2 %v3625_v29 }
  0x90   : > { %2326 = vmatpush.bf16.msra.mxu0 %v3629_v15  ;;  %2474 = vmatpush.bf16.msra.mxu3 %v3689_v32 }
  0x92   : > { %2375 = vmatpush.bf16.msra.mxu1 %v3693_v17 }
  0x93   : > { %2426 = vmatpush.bf16.msra.mxu2 %v3617_v2 }
  0x94   : > { %945 = vmatmul.bf16.gmra.mxu0 %v3061_v50 }
  0x95   : > { %994 = vmatmul.bf16.gmra.mxu1 %v3065_v51  ;;  %2327 = vmatpush.bf16.msra.mxu0 %v3621_v49  ;;  %v3817_v49 = vld [vmem:[%s4468_s6 + $0x34] sm:$0xf0] }
  0x96   : > { %1043 = vmatmul.bf16.gmra.mxu2 %v3061_v50  ;;  %v3776_v50 = vld [vmem:[%s4460_s3 + $0x74] sm:$0xf] }
  0x97   : > { %1092 = vmatmul.bf16.gmra.mxu3 %v3065_v51  ;;  %v3094_v51 = vld [vmem:[%s4460_s3 + $0x78] sm:$0xf0] }
  0x98   : > { %v3097_v53 = vor.u32 %v3776_v50, %v3094_v51  ;;  %v3684_v50 = vld [vmem:[#allocation10 + $0xd0] sm:$0xf]  ;;  %v3901_v51 = vld [vmem:[#allocation10 + $0xd4] sm:$0xf0] }
  0x99   : > { %v3685_v54 = vor.u32 %v3901_v51, %v3684_v50  ;;  %v3816_v50 = vld [vmem:[%s4468_s6 + $0x34] sm:$0xf]  ;;  %v3302_v51 = vld [vmem:[%s4468_s6 + $0x38] sm:$0xf0] }
  0x9b   : > { %2376 = vmatpush.bf16.msra.mxu1 %v3685_v54 }
  0x9f   : > { %2377 = vmatpush.bf16.msra.mxu1 %v3677_v30 }
  0xa4   : > { %950 = vmatmul.bf16.gmra.mxu0 %v3069_v4 }
  0xa5   : > { %999 = vmatmul.bf16.gmra.mxu1 %v3073_v5 }
  0xa6   : > { %1048 = vmatmul.bf16.gmra.mxu2 %v3069_v4  ;;  %v3811_v4 = vld [vmem:[%s4468_s6 + $0x4] sm:$0xf0] }
  0xa7   : > { %1097 = vmatmul.bf16.gmra.mxu3 %v3073_v5  ;;  %v3810_v5 = vld [vmem:[%s4468_s6 + $0x4] sm:$0xf]  ;;  %v3277_v8 = vor.u32 %v3811_v4, %v3276_v3  ;;  %v3678_v4 = vld [vmem:[#allocation10 + $0xc8] sm:$0xf0] }
  0xa8   : > { %v3281_v10 = vor.u32 %v3810_v5, %v3278_v6  ;;  %v3898_v3 = vld [vmem:[#allocation10 + $0xc4] sm:$0xf] }
  0xa9   : > { %v3681_v6 = vor.u32 %v3898_v3, %v3678_v4 }
  0xab   : > { %2475 = vmatpush.bf16.msra.mxu3 %v3681_v6 }
  0xb4   : > { %955 = vmatmul.bf16.gmra.mxu0 %v3077_v22 }
  0xb5   : > { %1004 = vmatmul.bf16.gmra.mxu1 %v3081_v23 }
  0xb6   : > { %1053 = vmatmul.bf16.gmra.mxu2 %v3077_v22 }
  0xb7   : > { %1102 = vmatmul.bf16.gmra.mxu3 %v3081_v23 }
  0xc4   : > { %960 = vmatmul.bf16.gmra.mxu0 %v3085_v40 }
  0xc5   : > { %1009 = vmatmul.bf16.gmra.mxu1 %v3089_v41 }
  0xc6   : > { %1058 = vmatmul.bf16.gmra.mxu2 %v3085_v40 }
  0xc7   : > { %1107 = vmatmul.bf16.gmra.mxu3 %v3089_v41  ;;  %v3285_v41 = vor.u32 %v3813_v35, %v3284_v34 }
  0xd4   : > { %965 = vmatmul.bf16.gmra.mxu0 %v3093_v52 }
  0xd5   : > { %1014 = vmatmul.bf16.gmra.mxu1 %v3097_v53 }
  0xd6   : > { %1063 = vmatmul.bf16.gmra.mxu2 %v3093_v52 }
  0xd7   : > { %1112 = vmatmul.bf16.gmra.mxu3 %v3097_v53 }
  0xe1   : > { %v931_v9 = vpop.f32.mrf.mxu0 }
  0xe2   : > { %v980_v14 = vpop.f32.mrf.mxu1  ;;  %v932_v18 = vadd.f32 %v931_v9, %v4523_v7  ;;  %v3292_v9 = vld [vmem:[%s4468_s6 + $0x20] sm:$0xf] }
  0xe4   : > { %1632 = vmatmul.bf16.vlgmr.msrb.gmra.mxu0 %v3277_v8  ;;  %v981_v21 = vadd.f32 %v980_v14, %v932_v18 }
  0xe5   : > { %1681 = vmatmul.bf16.vlgmr.msrb.gmra.mxu1 %v3281_v10 }
  0xe6   : > { %1730 = vmatmul.bf16.vlgmr.msrb.gmra.mxu2 %v3277_v8 }
  0xe7   : > { %1779 = vmatmul.bf16.vlgmr.msrb.gmra.mxu3 %v3281_v10  ;;  %v3815_v10 = vld [vmem:[%s4468_s6 + $0x24] sm:$0xf0] }
  0xe8   : > { %v3293_v16 = vor.u32 %v3815_v10, %v3292_v9 }
  0xe9   : > { %v1029_v20 = vpop.f32.mrf.mxu2  ;;  %v933_v24 = vpop.f32.mrf.mxu0 }
  0xea   : > { %v1030_v22 = vadd.f32 %v1029_v20, %v4528_v19  ;;  %v1078_v23 = vpop.f32.mrf.mxu3  ;;  %v982_v28 = vpop.f32.mrf.mxu1  ;;  %v934_v39 = vadd.f32 %v933_v24, %v4523_v7 }
  0xec   : > { %v1079_v31 = vadd.f32 %v1078_v23, %v1030_v22  ;;  %v983_v52 = vadd.f32 %v982_v28, %v934_v39  ;;  %v3612_v22 = vld [vmem:[#allocation10 + $0x40] sm:$0xf]  ;;  %v3883_v23 = vld [vmem:[#allocation10 + $0x44] sm:$0xf0]  ;;  %v3880_v39 = vld [vmem:[#allocation10 + $0x34] sm:$0xf] }
  0xed   : > { %v3613_v25 = vor.u32 %v3883_v23, %v3612_v22 }
  0xee   : > { %v1118_v33 = vpack.c.bf16 %v1079_v31, %v981_v21  ;;  %v3297_v21 = vor.u32 %v3814_v11, %v3294_v12 }
  0xef   : > { %2328 = vmatpush.bf16.msra.mxu0 %v3613_v25  ;;  %v3819_v25 = vld [vmem:[%s4468_s6 + $0x44] sm:$0xf0] }
  0xf0   : > { %1135 = vst.msk [vmem:[%s4537_s12] sm:$0xf] %vm1134_vm0, %v1118_v33  ;;  %v1232_v38 = vrot.slane %v1118_v33, 4  ;;  %1167 = vrot.lane.b32.xlu0 %v1118_v33, %s4254_s17 }
  0xf1   : > { %v1031_v40 = vpop.f32.mrf.mxu2  ;;  %v936_v44 = vpop.f32.mrf.mxu0 }
  0xf2   : > { %3242 = vst.msk [vmem:[%s4537_s12 + $0x80] sm:$0xf] %vm1134_vm0, %v1232_v38  ;;  %v1032_v42 = vadd.f32 %v1031_v40, %v4528_v19  ;;  %v1080_v43 = vpop.f32.mrf.mxu3  ;;  %v985_v48 = vpop.f32.mrf.mxu1  ;;  %v937_v56 = vadd.f32 %v936_v44, %v4523_v7  ;;  %v3606_v40 = vld [vmem:[#allocation10 + $0x38] sm:$0xf0] }
  0xf3   : > { %v3670_v44 = vld [vmem:[#allocation10 + $0xb8] sm:$0xf0] }
  0xf4   : > { %v1081_v53 = vadd.f32 %v1080_v43, %v1032_v42  ;;  %1637 = vmatmul.bf16.gmra.mxu0 %v3285_v41  ;;  %v986_v59 = vadd.f32 %v985_v48, %v937_v56  ;;  %v3609_v42 = vor.u32 %v3880_v39, %v3606_v40  ;;  %v3896_v43 = vld [vmem:[#allocation10 + $0xb4] sm:$0xf]  ;;  %v3300_v48 = vld [vmem:[%s4468_s6 + $0x30] sm:$0xf]  ;;  %v3660_v40 = vld [vmem:[#allocation10 + $0xa0] sm:$0xf] }
  0xf5   : > { %1686 = vmatmul.bf16.gmra.mxu1 %v3289_v45  ;;  %v3673_v46 = vor.u32 %v3896_v43, %v3670_v44 }
  0xf6   : > { %v1119_v55 = vpack.c.bf16 %v1081_v53, %v983_v52  ;;  %1735 = vmatmul.bf16.gmra.mxu2 %v3285_v41 }
  0xf7   : > { %1784 = vmatmul.bf16.gmra.mxu3 %v3289_v45  ;;  %2427 = vmatpush.bf16.msra.mxu2 %v3609_v42 }
  0xf8   : > { %1136 = vst.msk [vmem:[%s4537_s12 + $0x4] sm:$0xf] %vm1134_vm0, %v1119_v55  ;;  %v1233_v57 = vrot.slane %v1119_v55, 4  ;;  %1169 = vrot.lane.b32.xlu0 %v1119_v55, %s4254_s17  ;;  %2476 = vmatpush.bf16.msra.mxu3 %v3673_v46  ;;  %v3301_v55 = vor.u32 %v3817_v49, %v3300_v48 }
  0xf9   : > { %v1034_v58 = vpop.f32.mrf.mxu2  ;;  %v938_v62 = vpop.f32.mrf.mxu0 }
  0xfa   : > { %3243 = vst.msk [vmem:[%s4537_s12 + $0x84] sm:$0xf] %vm1134_vm0, %v1233_v57  ;;  %v1035_v60 = vadd.f32 %v1034_v58, %v4528_v19  ;;  %v1083_v61 = vpop.f32.mrf.mxu3  ;;  %v987_v1 = vpop.f32.mrf.mxu1  ;;  %v939_v14 = vadd.f32 %v938_v62, %v4523_v7 }
  0xfc   : > { %v1084_v5 = vadd.f32 %v1083_v61, %v1035_v60  ;;  %v988_v28 = vadd.f32 %v987_v1, %v939_v14  ;;  %v3604_v60 = vld [vmem:[#allocation10 + $0x30] sm:$0xf]  ;;  %v3881_v61 = vld [vmem:[#allocation10 + $0x34] sm:$0xf0]  ;;  %v3878_v14 = vld [vmem:[#allocation10 + $0x24] sm:$0xf] }
  0xfd   : > { %v3605_v63 = vor.u32 %v3881_v61, %v3604_v60  ;;  %v3897_v1 = vld [vmem:[#allocation10 + $0xb4] sm:$0xf0] }
  0xfe   : > { %v1120_v8 = vpack.c.bf16 %v1084_v5, %v986_v59  ;;  %v3305_v59 = vor.u32 %v3816_v50, %v3302_v51  ;;  %v3669_v4 = vor.u32 %v3897_v1, %v3668_v0  ;;  %v3820_v0 = vld [vmem:[%s4468_s6 + $0x54] sm:$0xf]  ;;  %v3318_v1 = vld [vmem:[%s4468_s6 + $0x58] sm:$0xf0] }
  0xff   : > { %2329 = vmatpush.bf16.msra.mxu0 %v3605_v63  ;;  %v3821_v63 = vld [vmem:[%s4468_s6 + $0x54] sm:$0xf0] }
 0x100   : > { %1137 = vst.msk [vmem:[%s4537_s12 + $0x8] sm:$0xf] %vm1134_vm0, %v1120_v8  ;;  %v1234_v13 = vrot.slane %v1120_v8, 4  ;;  %1171 = vrot.lane.b32.xlu1 %v1120_v8, %s4254_s17  ;;  %2378 = vmatpush.bf16.msra.mxu1 %v3669_v4 }
 0x101   : > { %v1036_v15 = vpop.f32.mrf.mxu2  ;;  %v941_v20 = vpop.f32.mrf.mxu0 }
 0x102   : > { %3244 = vst.msk [vmem:[%s4537_s12 + $0x88] sm:$0xf] %vm1134_vm0, %v1234_v13  ;;  %v1037_v17 = vadd.f32 %v1036_v15, %v4528_v19  ;;  %v1085_v18 = vpop.f32.mrf.mxu3  ;;  %v990_v24 = vpop.f32.mrf.mxu1  ;;  %v942_v32 = vadd.f32 %v941_v20, %v4523_v7  ;;  %v3598_v15 = vld [vmem:[#allocation10 + $0x28] sm:$0xf0] }
 0x103   : > { %v3662_v20 = vld [vmem:[#allocation10 + $0xa8] sm:$0xf0] }
 0x104   : > { %v1086_v29 = vadd.f32 %v1085_v18, %v1037_v17  ;;  %1642 = vmatmul.bf16.gmra.mxu0 %v3293_v16  ;;  %v991_v35 = vadd.f32 %v990_v24, %v942_v32  ;;  %v3601_v17 = vor.u32 %v3878_v14, %v3598_v15  ;;  %v3894_v18 = vld [vmem:[#allocation10 + $0xa4] sm:$0xf]  ;;  %v3308_v24 = vld [vmem:[%s4468_s6 + $0x40] sm:$0xf]  ;;  %v3652_v15 = vld [vmem:[#allocation10 + $0x90] sm:$0xf] }
 0x105   : > { %1691 = vmatmul.bf16.gmra.mxu1 %v3297_v21  ;;  %v3665_v22 = vor.u32 %v3894_v18, %v3662_v20 }
 0x106   : > { %v1121_v31 = vpack.c.bf16 %v1086_v29, %v988_v28  ;;  %1740 = vmatmul.bf16.gmra.mxu2 %v3293_v16 }
 0x107   : > { %1789 = vmatmul.bf16.gmra.mxu3 %v3297_v21  ;;  %2428 = vmatpush.bf16.msra.mxu2 %v3601_v17 }
 0x108   : > { %1138 = vst.msk [vmem:[%s4537_s12 + $0xc] sm:$0xf] %vm1134_vm0, %v1121_v31  ;;  %v1235_v33 = vrot.slane %v1121_v31, 4  ;;  %1173 = vrot.lane.b32.xlu1 %v1121_v31, %s4254_s17  ;;  %2477 = vmatpush.bf16.msra.mxu3 %v3665_v22  ;;  %v3309_v31 = vor.u32 %v3819_v25, %v3308_v24 }
 0x109   : > { %v1039_v34 = vpop.f32.mrf.mxu2  ;;  %v943_v38 = vpop.f32.mrf.mxu0 }
 0x10a   : > { %3245 = vst.msk [vmem:[%s4537_s12 + $0x8c] sm:$0xf] %vm1134_vm0, %v1235_v33  ;;  %v1040_v36 = vadd.f32 %v1039_v34, %v4528_v19  ;;  %v1088_v37 = vpop.f32.mrf.mxu3  ;;  %v992_v41 = vpop.f32.mrf.mxu1  ;;  %v944_v53 = vadd.f32 %v943_v38, %v4523_v7 }
 0x10c   : > { %v1089_v45 = vadd.f32 %v1088_v37, %v1040_v36  ;;  %v993_v2 = vadd.f32 %v992_v41, %v944_v53  ;;  %v3596_v36 = vld [vmem:[#allocation10 + $0x20] sm:$0xf]  ;;  %v3879_v37 = vld [vmem:[#allocation10 + $0x24] sm:$0xf0]  ;;  %v3876_v53 = vld [vmem:[#allocation10 + $0x14] sm:$0xf] }
 0x10d   : > { %v3597_v39 = vor.u32 %v3879_v37, %v3596_v36  ;;  %v3895_v41 = vld [vmem:[#allocation10 + $0xa4] sm:$0xf0] }
 0x10e   : > { %v1122_v47 = vpack.c.bf16 %v1089_v45, %v991_v35  ;;  %v3313_v35 = vor.u32 %v3818_v26, %v3310_v27  ;;  %v3661_v44 = vor.u32 %v3895_v41, %v3660_v40  ;;  %v3822_v40 = vld [vmem:[%s4468_s6 + $0x64] sm:$0xf]  ;;  %v3326_v41 = vld [vmem:[%s4468_s6 + $0x68] sm:$0xf0] }
 0x10f   : > { %2330 = vmatpush.bf16.msra.mxu0 %v3597_v39  ;;  %v3823_v39 = vld [vmem:[%s4468_s6 + $0x64] sm:$0xf0] }
 0x110   : > { %1139 = vst.msk [vmem:[%s4537_s12 + $0x10] sm:$0xf] %vm1134_vm0, %v1122_v47  ;;  %v1236_v52 = vrot.slane %v1122_v47, 4  ;;  %1175 = vrot.lane.b32.xlu2 %v1122_v47, %s4254_s17  ;;  %2379 = vmatpush.bf16.msra.mxu1 %v3661_v44 }
 0x111   : > { %v1041_v54 = vpop.f32.mrf.mxu2  ;;  %v946_v58 = vpop.f32.mrf.mxu0 }
 0x112   : > { %3246 = vst.msk [vmem:[%s4537_s12 + $0x90] sm:$0xf] %vm1134_vm0, %v1236_v52  ;;  %v1042_v56 = vadd.f32 %v1041_v54, %v4528_v19  ;;  %v1090_v57 = vpop.f32.mrf.mxu3  ;;  %v995_v62 = vpop.f32.mrf.mxu1  ;;  %v947_v6 = vadd.f32 %v946_v58, %v4523_v7  ;;  %v3590_v54 = vld [vmem:[#allocation10 + $0x18] sm:$0xf0] }
 0x113   : > { %v3654_v58 = vld [vmem:[#allocation10 + $0x98] sm:$0xf0] }
 0x114   : > { %v1091_v3 = vadd.f32 %v1090_v57, %v1042_v56  ;;  %1647 = vmatmul.bf16.gmra.mxu0 %v3301_v55  ;;  %v996_v10 = vadd.f32 %v995_v62, %v947_v6  ;;  %v3593_v56 = vor.u32 %v3876_v53, %v3590_v54  ;;  %v3892_v57 = vld [vmem:[#allocation10 + $0x94] sm:$0xf]  ;;  %v3316_v62 = vld [vmem:[%s4468_s6 + $0x50] sm:$0xf]  ;;  %v3891_v54 = vld [vmem:[#allocation10 + $0x84] sm:$0xf0] }
 0x115   : > { %1696 = vmatmul.bf16.gmra.mxu1 %v3305_v59  ;;  %v3657_v60 = vor.u32 %v3892_v57, %v3654_v58 }
 0x116   : > { %v1123_v5 = vpack.c.bf16 %v1091_v3, %v993_v2  ;;  %1745 = vmatmul.bf16.gmra.mxu2 %v3301_v55 }
 0x117   : > { %1794 = vmatmul.bf16.gmra.mxu3 %v3305_v59  ;;  %2429 = vmatpush.bf16.msra.mxu2 %v3593_v56 }
 0x118   : > { %1140 = vst.msk [vmem:[%s4537_s12 + $0x14] sm:$0xf] %vm1134_vm0, %v1123_v5  ;;  %v1237_v8 = vrot.slane %v1123_v5, 4  ;;  %1177 = vrot.lane.b32.xlu2 %v1123_v5, %s4254_s17  ;;  %2478 = vmatpush.bf16.msra.mxu3 %v3657_v60  ;;  %v3317_v5 = vor.u32 %v3821_v63, %v3316_v62 }
 0x119   : > { %v1044_v9 = vpop.f32.mrf.mxu2  ;;  %v948_v13 = vpop.f32.mrf.mxu0 }
 0x11a   : > { %3247 = vst.msk [vmem:[%s4537_s12 + $0x94] sm:$0xf] %vm1134_vm0, %v1237_v8  ;;  %v1045_v11 = vadd.f32 %v1044_v9, %v4528_v19  ;;  %v1093_v12 = vpop.f32.mrf.mxu3  ;;  %v997_v16 = vpop.f32.mrf.mxu1  ;;  %v949_v29 = vadd.f32 %v948_v13, %v4523_v7 }
 0x11c   : > { %v1094_v21 = vadd.f32 %v1093_v12, %v1045_v11  ;;  %v998_v42 = vadd.f32 %v997_v16, %v949_v29  ;;  %v3588_v11 = vld [vmem:[#allocation10 + $0x10] sm:$0xf]  ;;  %v3877_v12 = vld [vmem:[#allocation10 + $0x14] sm:$0xf0]  ;;  %v3874_v29 = vld [vmem:[#allocation10 + $0x4] sm:$0xf] }
 0x11d   : > { %v3589_v14 = vor.u32 %v3877_v12, %v3588_v11  ;;  %v3893_v16 = vld [vmem:[#allocation10 + $0x94] sm:$0xf0] }
 0x11e   : > { %v1124_v23 = vpack.c.bf16 %v1094_v21, %v996_v10  ;;  %v3321_v10 = vor.u32 %v3820_v0, %v3318_v1  ;;  %v3653_v20 = vor.u32 %v3893_v16, %v3652_v15 }
 0x11f   : > { %2331 = vmatpush.bf16.msra.mxu0 %v3589_v14 }
 0x120   : > { %1141 = vst.msk [vmem:[%s4537_s12 + $0x18] sm:$0xf] %vm1134_vm0, %v1124_v23  ;;  %v1238_v28 = vrot.slane %v1124_v23, 4  ;;  %1179 = vrot.lane.b32.xlu0 %v1124_v23, %s4254_s17  ;;  %2380 = vmatpush.bf16.msra.mxu1 %v3653_v20 }
 0x121   : > { %v1046_v30 = vpop.f32.mrf.mxu2  ;;  %v951_v34 = vpop.f32.mrf.mxu0 }
 0x122   : > { %3248 = vst.msk [vmem:[%s4537_s12 + $0x98] sm:$0xf] %vm1134_vm0, %v1238_v28  ;;  %v1047_v32 = vadd.f32 %v1046_v30, %v4528_v19  ;;  %v1095_v33 = vpop.f32.mrf.mxu3  ;;  %v1000_v38 = vpop.f32.mrf.mxu1  ;;  %v952_v46 = vadd.f32 %v951_v34, %v4523_v7  ;;  %v3582_v30 = vld [vmem:[#allocation10 + $0x8] sm:$0xf0] }
 0x123   : > { %v3646_v34 = vld [vmem:[#allocation10 + $0x88] sm:$0xf0] }
 0x124   : > { %v1096_v43 = vadd.f32 %v1095_v33, %v1047_v32  ;;  %1652 = vmatmul.bf16.gmra.mxu0 %v3309_v31  ;;  %v1001_v49 = vadd.f32 %v1000_v38, %v952_v46  ;;  %v3585_v32 = vor.u32 %v3874_v29, %v3582_v30  ;;  %v3890_v33 = vld [vmem:[#allocation10 + $0x84] sm:$0xf]  ;;  %v3324_v38 = vld [vmem:[%s4468_s6 + $0x60] sm:$0xf] }
 0x125   : > { %1701 = vmatmul.bf16.gmra.mxu1 %v3313_v35  ;;  %v3649_v36 = vor.u32 %v3890_v33, %v3646_v34  ;;  %v3580_v46 = vld [vmem:[#allocation10] sm:$0xf] }
 0x126   : > { %v1125_v45 = vpack.c.bf16 %v1096_v43, %v998_v42  ;;  %1750 = vmatmul.bf16.gmra.mxu2 %v3309_v31  ;;  %v3516_v34 = vld [vmem:[%s4474_s29] sm:$0xf] }
 0x127   : > { %1799 = vmatmul.bf16.gmra.mxu3 %v3313_v35  ;;  %2430 = vmatpush.bf16.msra.mxu2 %v3585_v32 }
 0x128   : > { %1142 = vst.msk [vmem:[%s4537_s12 + $0x1c] sm:$0xf] %vm1134_vm0, %v1125_v45  ;;  %v1239_v47 = vrot.slane %v1125_v45, 4  ;;  %1181 = vrot.lane.b32.xlu1 %v1125_v45, %s4254_s17  ;;  %2479 = vmatpush.bf16.msra.mxu3 %v3649_v36  ;;  %v3325_v45 = vor.u32 %v3823_v39, %v3324_v38  ;;  %v1378_v36 = vld [vmem:[%s5213_s10] sm:$0x3] }
 0x129   : > { %v1049_v48 = vpop.f32.mrf.mxu2  ;;  %v953_v52 = vpop.f32.mrf.mxu0  ;;  %v3518_v38 = vld [vmem:[%s4474_s29 + $0x8] sm:$0xf0] }
 0x12a   : > { %3249 = vst.msk [vmem:[%s4537_s12 + $0x9c] sm:$0xf] %vm1134_vm0, %v1239_v47  ;;  %v1050_v50 = vadd.f32 %v1049_v48, %v4528_v19  ;;  %v1098_v51 = vpop.f32.mrf.mxu3  ;;  %v1002_v55 = vpop.f32.mrf.mxu1  ;;  %v954_v3 = vadd.f32 %v953_v52, %v4523_v7  ;;  %v3875_v47 = vld [vmem:[#allocation10 + $0x4] sm:$0xf0]  ;;  %v3644_v48 = vld [vmem:[#allocation10 + $0x80] sm:$0xf]  ;;  %v3329_v52 = vor.u32 %v3822_v40, %v3326_v41 }
 0x12b   : > { %v3581_v53 = vor.u32 %v3875_v47, %v3580_v46  ;;  %v3645_v56 = vor.u32 %v3891_v54, %v3644_v48  ;;  %v4679_v46 = vperm.slane %v1378_v36, 0 }
 0x12c   : > { %v1099_v59 = vadd.f32 %v1098_v51, %v1050_v50  ;;  %v1003_v17 = vadd.f32 %v1002_v55, %v954_v3 }
 0x12d   : > { %2332 = vmatpush.bf16.msra.mxu0 %v3581_v53  ;;  %2381 = vmatpush.bf16.msra.mxu1 %v3645_v56  ;;  %v4686_v53 = vperm.slane %v1378_v36, 1 }
 0x12e   : > { %v1126_v61 = vpack.c.bf16 %v1099_v59, %v1001_v49 }
 0x130   : > { %1143 = vst.msk [vmem:[%s4537_s12 + $0x20] sm:$0xf] %vm1134_vm0, %v1126_v61  ;;  %v1240_v2 = vrot.slane %v1126_v61, 4  ;;  %1183 = vrot.lane.b32.xlu2 %v1126_v61, %s4254_s17 }
 0x131   : > { %v1051_v4 = vpop.f32.mrf.mxu2  ;;  %v956_v9 = vpop.f32.mrf.mxu0 }
 0x132   : > { %3250 = vst.msk [vmem:[%s4537_s12 + $0xa0] sm:$0xf] %vm1134_vm0, %v1240_v2  ;;  %v1052_v6 = vadd.f32 %v1051_v4, %v4528_v19  ;;  %v1100_v8 = vpop.f32.mrf.mxu3  ;;  %v1005_v13 = vpop.f32.mrf.mxu1  ;;  %v957_v22 = vadd.f32 %v956_v9, %v4523_v7  ;;  %v3824_v9 = vld [vmem:[%s4468_s6 + $0x74] sm:$0xf] }
 0x134   : > { %v1101_v18 = vadd.f32 %v1100_v8, %v1052_v6  ;;  %1657 = vmatmul.bf16.gmra.mxu0 %v3317_v5  ;;  %v1006_v25 = vadd.f32 %v1005_v13, %v957_v22  ;;  %v3332_v6 = vld [vmem:[%s4468_s6 + $0x70] sm:$0xf]  ;;  %v3825_v8 = vld [vmem:[%s4468_s6 + $0x74] sm:$0xf0] }
 0x135   : > { %1706 = vmatmul.bf16.gmra.mxu1 %v3321_v10  ;;  %v3333_v14 = vor.u32 %v3825_v8, %v3332_v6  ;;  %v3526_v6 = vld [vmem:[%s4474_s29 + $0x18] sm:$0xf0] }
 0x136   : > { %v1127_v21 = vpack.c.bf16 %v1101_v18, %v1003_v17  ;;  %1755 = vmatmul.bf16.gmra.mxu2 %v3317_v5 }
 0x137   : > { %1804 = vmatmul.bf16.gmra.mxu3 %v3321_v10  ;;  %v3334_v10 = vld [vmem:[%s4468_s6 + $0x78] sm:$0xf0] }
 0x138   : > { %1144 = vst.msk [vmem:[%s4537_s12 + $0x24] sm:$0xf] %vm1134_vm0, %v1127_v21  ;;  %v1241_v23 = vrot.slane %v1127_v21, 4  ;;  %1185 = vrot.lane.b32.xlu0 %v1127_v21, %s4254_s17  ;;  %v3337_v18 = vor.u32 %v3824_v9, %v3334_v10 }
 0x139   : > { %v1054_v24 = vpop.f32.mrf.mxu2  ;;  %v958_v28 = vpop.f32.mrf.mxu0 }
 0x13a   : > { %3251 = vst.msk [vmem:[%s4537_s12 + $0xa4] sm:$0xf] %vm1134_vm0, %v1241_v23  ;;  %v1055_v26 = vadd.f32 %v1054_v24, %v4528_v19  ;;  %v1103_v27 = vpop.f32.mrf.mxu3  ;;  %v1007_v31 = vpop.f32.mrf.mxu1  ;;  %v959_v43 = vadd.f32 %v958_v28, %v4523_v7 }
 0x13c   : > { %v1104_v35 = vadd.f32 %v1103_v27, %v1055_v26  ;;  %v1008_v57 = vadd.f32 %v1007_v31, %v959_v43 }
 0x13e   : > { %v1128_v37 = vpack.c.bf16 %v1104_v35, %v1006_v25  ;;  %v3859_v35 = vld [vmem:[%s4474_s29 + $0x4] sm:$0xf0] }
 0x140   : > { %1145 = vst.msk [vmem:[%s4537_s12 + $0x28] sm:$0xf] %vm1134_vm0, %v1128_v37  ;;  %v1242_v42 = vrot.slane %v1128_v37, 4  ;;  %1187 = vrot.lane.b32.xlu1 %v1128_v37, %s4254_s17  ;;  %v3858_v37 = vld [vmem:[%s4474_s29 + $0x4] sm:$0xf] }
 0x141   : > { %v1056_v44 = vpop.f32.mrf.mxu2  ;;  %v961_v51 = vpop.f32.mrf.mxu0  ;;  %v3521_v47 = vor.u32 %v3858_v37, %v3518_v38  ;;  %v3532_v37 = vld [vmem:[%s4474_s29 + $0x20] sm:$0xf]  ;;  %v3863_v38 = vld [vmem:[%s4474_s29 + $0x24] sm:$0xf0] }
 0x142   : > { %3252 = vst.msk [vmem:[%s4537_s12 + $0xa8] sm:$0xf] %vm1134_vm0, %v1242_v42  ;;  %v1057_v49 = vadd.f32 %v1056_v44, %v4528_v19  ;;  %v1105_v50 = vpop.f32.mrf.mxu3  ;;  %v1010_v55 = vpop.f32.mrf.mxu1  ;;  %v962_v60 = vadd.f32 %v961_v51, %v4523_v7  ;;  %v3517_v42 = vor.u32 %v3859_v35, %v3516_v34 }
 0x144   : > { %v1106_v58 = vadd.f32 %v1105_v50, %v1057_v49  ;;  %1662 = vmatmul.bf16.gmra.mxu0 %v3325_v45  ;;  %v1011_v63 = vadd.f32 %v1010_v55, %v962_v60 }
 0x145   : > { %1711 = vmatmul.bf16.gmra.mxu1 %v3329_v52 }
 0x146   : > { %v1129_v59 = vpack.c.bf16 %v1106_v58, %v1008_v57  ;;  %1760 = vmatmul.bf16.gmra.mxu2 %v3325_v45 }
 0x147   : > { %1809 = vmatmul.bf16.gmra.mxu3 %v3329_v52 }
 0x148   : > { %1146 = vst.msk [vmem:[%s4537_s12 + $0x2c] sm:$0xf] %vm1134_vm0, %v1129_v59  ;;  %v1243_v61 = vrot.slane %v1129_v59, 4  ;;  %1189 = vrot.lane.b32.xlu2 %v1129_v59, %s4254_s17 }
 0x149   : > { %v1059_v62 = vpop.f32.mrf.mxu2  ;;  %v963_v2 = vpop.f32.mrf.mxu0 }
 0x14a   : > { %3253 = vst.msk [vmem:[%s4537_s12 + $0xac] sm:$0xf] %vm1134_vm0, %v1243_v61  ;;  %v1060_v0 = vadd.f32 %v1059_v62, %v4528_v19  ;;  %v1108_v1 = vpop.f32.mrf.mxu3  ;;  %v1012_v3 = vpop.f32.mrf.mxu1  ;;  %v964_v12 = vadd.f32 %v963_v2, %v4523_v7 }
 0x14c   : > { %v1109_v4 = vadd.f32 %v1108_v1, %v1060_v0  ;;  %v1013_v21 = vadd.f32 %v1012_v3, %v964_v12  ;;  %v3524_v3 = vld [vmem:[%s4474_s29 + $0x10] sm:$0xf] }
 0x14e   : > { %v1130_v5 = vpack.c.bf16 %v1109_v4, %v1011_v63  ;;  %v3861_v4 = vld [vmem:[%s4474_s29 + $0x14] sm:$0xf0] }
 0x150   : > { %1147 = vst.msk [vmem:[%s4537_s12 + $0x30] sm:$0xf] %vm1134_vm0, %v1130_v5  ;;  %v1244_v11 = vrot.slane %v1130_v5, 4  ;;  %1191 = vrot.lane.b32.xlu0 %v1130_v5, %s4254_s17  ;;  %v3860_v5 = vld [vmem:[%s4474_s29 + $0x14] sm:$0xf] }
 0x151   : > { %v1061_v13 = vpop.f32.mrf.mxu2  ;;  %v966_v17 = vpop.f32.mrf.mxu0 }
 0x152   : > { %3254 = vst.msk [vmem:[%s4537_s12 + $0xb0] sm:$0xf] %vm1134_vm0, %v1244_v11  ;;  %v1062_v15 = vadd.f32 %v1061_v13, %v4528_v19  ;;  %v1110_v16 = vpop.f32.mrf.mxu3  ;;  %v1015_v20 = vpop.f32.mrf.mxu1  ;;  %v967_v24 = vadd.f32 %v966_v17, %v4523_v7  ;;  %v3525_v11 = vor.u32 %v3861_v4, %v3524_v3  ;;  %v3864_v3 = vld [vmem:[%s4474_s29 + $0x34] sm:$0xf]  ;;  %v3542_v4 = vld [vmem:[%s4474_s29 + $0x38] sm:$0xf0] }
 0x154   : > { %v1111_v22 = vadd.f32 %v1110_v16, %v1062_v15  ;;  %1667 = vmatmul.bf16.gmra.mxu0 %v3333_v14  ;;  %v1016_v27 = vadd.f32 %v1015_v20, %v967_v24  ;;  %v3529_v15 = vor.u32 %v3860_v5, %v3526_v6 }
 0x155   : > { %1716 = vmatmul.bf16.gmra.mxu1 %v3337_v18 }
 0x156   : > { %v1131_v23 = vpack.c.bf16 %v1111_v22, %v1013_v21  ;;  %1765 = vmatmul.bf16.gmra.mxu2 %v3333_v14 }
 0x157   : > { %1814 = vmatmul.bf16.gmra.mxu3 %v3337_v18 }
 0x158   : > { %1148 = vst.msk [vmem:[%s4537_s12 + $0x34] sm:$0xf] %vm1134_vm0, %v1131_v23  ;;  %v1245_v25 = vrot.slane %v1131_v23, 4  ;;  %1193 = vrot.lane.b32.xlu1 %v1131_v23, %s4254_s17 }
 0x159   : > { %v1064_v26 = vpop.f32.mrf.mxu2  ;;  %v968_v30 = vpop.f32.mrf.mxu0 }
 0x15a   : > { %3255 = vst.msk [vmem:[%s4537_s12 + $0xb4] sm:$0xf] %vm1134_vm0, %v1245_v25  ;;  %v1065_v28 = vadd.f32 %v1064_v26, %v4528_v19  ;;  %v1113_v29 = vpop.f32.mrf.mxu3  ;;  %v1017_v31 = vpop.f32.mrf.mxu1  ;;  %v969_v40 = vadd.f32 %v968_v30, %v4523_v7 }
 0x15c   : > { %v1114_v32 = vadd.f32 %v1113_v29, %v1065_v28  ;;  %v1018_v50 = vadd.f32 %v1017_v31, %v969_v40  ;;  %v3534_v40 = vld [vmem:[%s4474_s29 + $0x28] sm:$0xf0] }
 0x15e   : > { %v1132_v33 = vpack.c.bf16 %v1114_v32, %v1016_v27 }
 0x160   : > { %1149 = vst.msk [vmem:[%s4537_s12 + $0x38] sm:$0xf] %vm1134_vm0, %v1132_v33  ;;  %v1246_v39 = vrot.slane %v1132_v33, 4  ;;  %1195 = vrot.lane.b32.xlu2 %v1132_v33, %s4254_s17 }
 0x161   : > { %v1066_v41 = vpop.f32.mrf.mxu2  ;;  %v1633_v49 = vpop.f32.mrf.mxu0 }
 0x162   : > { %3256 = vst.msk [vmem:[%s4537_s12 + $0xb8] sm:$0xf] %vm1134_vm0, %v1246_v39  ;;  %v1067_v43 = vadd.f32 %v1066_v41, %v4528_v19  ;;  %v1115_v44 = vpop.f32.mrf.mxu3  ;;  %v1168_v45 = vpop.permute.xlu0 %1167  ;;  %v1634_v19 = vadd.f32 %v1633_v49, %v4679_v46  ;;  %v3862_v39 = vld [vmem:[%s4474_s29 + $0x24] sm:$0xf] }
 0x163   : > { %3226 = vst.msk [vmem:[%s4537_s12 + $0x40] sm:$0xf] %vm1134_vm0, %v1168_v45  ;;  %v1281_v48 = vrot.slane %v1168_v45, 4  ;;  %v1682_v7 = vpop.f32.mrf.mxu1 }
 0x164   : > { %v1116_v51 = vadd.f32 %v1115_v44, %v1067_v43  ;;  %2333 = vmatmul.bf16.vlgmr.msra.gmra.mxu0 %v3517_v42  ;;  %v1683_v56 = vadd.f32 %v1682_v7, %v1634_v19  ;;  %v3533_v44 = vor.u32 %v3863_v38, %v3532_v37 }
 0x165   : > { %3258 = vst.msk [vmem:[%s4537_s12 + $0xc0] sm:$0xf] %vm1134_vm0, %v1281_v48  ;;  %2382 = vmatmul.bf16.vlgmr.msra.gmra.mxu1 %v3521_v47  ;;  %v3537_v48 = vor.u32 %v3862_v39, %v3534_v40 }
 0x166   : > { %v1133_v52 = vpack.c.bf16 %v1116_v51, %v1018_v50  ;;  %2431 = vmatmul.bf16.vlgmr.msra.gmra.mxu2 %v3517_v42 }
 0x167   : > { %2480 = vmatmul.bf16.vlgmr.msra.gmra.mxu3 %v3521_v47 }
 0x168   : > { %1150 = vst.msk [vmem:[%s4537_s12 + $0x3c] sm:$0xf] %vm1134_vm0, %v1133_v52  ;;  %v1247_v54 = vrot.slane %v1133_v52, 4  ;;  %1197 = vrot.lane.b32.xlu0 %v1133_v52, %s4254_s17 }
 0x169   : > { %v1731_v55 = vpop.f32.mrf.mxu2  ;;  %v1635_v62 = vpop.f32.mrf.mxu0 }
 0x16a   : > { %3257 = vst.msk [vmem:[%s4537_s12 + $0xbc] sm:$0xf] %vm1134_vm0, %v1247_v54  ;;  %v1732_v57 = vadd.f32 %v1731_v55, %v4686_v53  ;;  %v1780_v58 = vpop.f32.mrf.mxu3  ;;  %v1176_v59 = vpop.permute.xlu2 %1175  ;;  %v1636_v9 = vadd.f32 %v1635_v62, %v4679_v46 }
 0x16b   : > { %3230 = vst.msk [vmem:[%s4537_s12 + $0x50] sm:$0xf] %vm1134_vm0, %v1176_v59  ;;  %v1285_v60 = vrot.slane %v1176_v59, 4  ;;  %v1170_v61 = vpop.permute.xlu0 %1169  ;;  %v1684_v1 = vpop.f32.mrf.mxu1 }
 0x16c   : > { %v1781_v63 = vadd.f32 %v1780_v58, %v1732_v57  ;;  %3227 = vst.msk [vmem:[%s4537_s12 + $0x44] sm:$0xf] %vm1134_vm0, %v1170_v61  ;;  %v1282_v0 = vrot.slane %v1170_v61, 4  ;;  %v1685_v20 = vadd.f32 %v1684_v1, %v1636_v9  ;;  %v3540_v1 = vld [vmem:[%s4474_s29 + $0x30] sm:$0xf] }
 0x16d   : > { %3262 = vst.msk [vmem:[%s4537_s12 + $0xd0] sm:$0xf] %vm1134_vm0, %v1285_v60 }
 0x16e   : > { %v1820_v2 = vpack.c.bf16 %v1781_v63, %v1683_v56  ;;  %3259 = vst.msk [vmem:[%s4537_s12 + $0xc4] sm:$0xf] %vm1134_vm0, %v1282_v0 }
 0x170   : > { %1836 = vst.msk [vmem:[%s4702_s13] sm:$0xf] %vm1134_vm0, %v1820_v2  ;;  %v1933_v8 = vrot.slane %v1820_v2, 4  ;;  %1868 = vrot.lane.b32.xlu1 %v1820_v2, %s4254_s17  ;;  %v3865_v2 = vld [vmem:[%s4474_s29 + $0x34] sm:$0xf0] }
 0x171   : > { %v1733_v10 = vpop.f32.mrf.mxu2  ;;  %v1638_v18 = vpop.f32.mrf.mxu0  ;;  %v3541_v9 = vor.u32 %v3865_v2, %v3540_v1  ;;  %v3868_v1 = vld [vmem:[%s4474_s29 + $0x54] sm:$0xf]  ;;  %v3558_v2 = vld [vmem:[%s4474_s29 + $0x58] sm:$0xf0] }
 0x172   : > { %3482 = vst.msk [vmem:[%s4702_s13 + $0x80] sm:$0xf] %vm1134_vm0, %v1933_v8  ;;  %v1734_v12 = vadd.f32 %v1733_v10, %v4686_v53  ;;  %v1782_v13 = vpop.f32.mrf.mxu3  ;;  %v1178_v14 = vpop.permute.xlu2 %1177  ;;  %v1639_v25 = vadd.f32 %v1638_v18, %v4679_v46 }
 0x173   : > { %3231 = vst.msk [vmem:[%s4537_s12 + $0x54] sm:$0xf] %vm1134_vm0, %v1178_v14  ;;  %v1286_v16 = vrot.slane %v1178_v14, 4  ;;  %v1172_v17 = vpop.permute.xlu1 %1171  ;;  %v1687_v23 = vpop.f32.mrf.mxu1 }
 0x174   : > { %v1783_v21 = vadd.f32 %v1782_v13, %v1734_v12  ;;  %3228 = vst.msk [vmem:[%s4537_s12 + $0x48] sm:$0xf] %vm1134_vm0, %v1172_v17  ;;  %v1283_v22 = vrot.slane %v1172_v17, 4  ;;  %2338 = vmatmul.bf16.gmra.mxu0 %v3525_v11  ;;  %v1688_v28 = vadd.f32 %v1687_v23, %v1639_v25  ;;  %v3545_v13 = vor.u32 %v3864_v3, %v3542_v4 }
 0x175   : > { %3263 = vst.msk [vmem:[%s4537_s12 + $0xd4] sm:$0xf] %vm1134_vm0, %v1286_v16  ;;  %2387 = vmatmul.bf16.gmra.mxu1 %v3529_v15 }
 0x176   : > { %v1821_v24 = vpack.c.bf16 %v1783_v21, %v1685_v20  ;;  %3260 = vst.msk [vmem:[%s4537_s12 + $0xc8] sm:$0xf] %vm1134_vm0, %v1283_v22  ;;  %2436 = vmatmul.bf16.gmra.mxu2 %v3525_v11 }
 0x177   : > { %2485 = vmatmul.bf16.gmra.mxu3 %v3529_v15 }
 0x178   : > { %1837 = vst.msk [vmem:[%s4702_s13 + $0x4] sm:$0xf] %vm1134_vm0, %v1821_v24  ;;  %v1934_v26 = vrot.slane %v1821_v24, 4  ;;  %1870 = vrot.lane.b32.xlu2 %v1821_v24, %s4254_s17 }
 0x179   : > { %v1736_v27 = vpop.f32.mrf.mxu2  ;;  %v1640_v32 = vpop.f32.mrf.mxu0 }
 0x17a   : > { %3483 = vst.msk [vmem:[%s4702_s13 + $0x84] sm:$0xf] %vm1134_vm0, %v1934_v26  ;;  %v1737_v29 = vadd.f32 %v1736_v27, %v4686_v53  ;;  %v1785_v30 = vpop.f32.mrf.mxu3  ;;  %v1641_v42 = vadd.f32 %v1640_v32, %v4679_v46 }
 0x17b   : > { %v1174_v31 = vpop.permute.xlu1 %1173  ;;  %v1689_v35 = vpop.f32.mrf.mxu1 }
 0x17c   : > { %v1786_v33 = vadd.f32 %v1785_v30, %v1737_v29  ;;  %3229 = vst.msk [vmem:[%s4537_s12 + $0x4c] sm:$0xf] %vm1134_vm0, %v1174_v31  ;;  %v1284_v34 = vrot.slane %v1174_v31, 4  ;;  %v1690_v7 = vadd.f32 %v1689_v35, %v1641_v42  ;;  %v3866_v35 = vld [vmem:[%s4474_s29 + $0x44] sm:$0xf] }
 0x17e   : > { %v1822_v36 = vpack.c.bf16 %v1786_v33, %v1688_v28  ;;  %3261 = vst.msk [vmem:[%s4537_s12 + $0xcc] sm:$0xf] %vm1134_vm0, %v1284_v34  ;;  %v3548_v33 = vld [vmem:[%s4474_s29 + $0x40] sm:$0xf]  ;;  %v3867_v34 = vld [vmem:[%s4474_s29 + $0x44] sm:$0xf0] }
 0x17f   : > { %v3549_v40 = vor.u32 %v3867_v34, %v3548_v33  ;;  %v3870_v33 = vld [vmem:[%s4474_s29 + $0x64] sm:$0xf]  ;;  %v3566_v34 = vld [vmem:[%s4474_s29 + $0x68] sm:$0xf0] }
 0x180   : > { %1838 = vst.msk [vmem:[%s4702_s13 + $0x8] sm:$0xf] %vm1134_vm0, %v1822_v36  ;;  %v1935_v41 = vrot.slane %v1822_v36, 4  ;;  %1872 = vrot.lane.b32.xlu0 %v1822_v36, %s4254_s17  ;;  %v3550_v36 = vld [vmem:[%s4474_s29 + $0x48] sm:$0xf0] }
 0x181   : > { %v1738_v43 = vpop.f32.mrf.mxu2  ;;  %v1643_v49 = vpop.f32.mrf.mxu0 }
 0x182   : > { %3484 = vst.msk [vmem:[%s4702_s13 + $0x88] sm:$0xf] %vm1134_vm0, %v1935_v41  ;;  %v1739_v45 = vadd.f32 %v1738_v43, %v4686_v53  ;;  %v1787_v47 = vpop.f32.mrf.mxu3  ;;  %v1644_v19 = vadd.f32 %v1643_v49, %v4679_v46 }
 0x183   : > { %v1692_v51 = vpop.f32.mrf.mxu1 }
 0x184   : > { %v1788_v50 = vadd.f32 %v1787_v47, %v1739_v45  ;;  %2343 = vmatmul.bf16.gmra.mxu0 %v3533_v44  ;;  %v1693_v56 = vadd.f32 %v1692_v51, %v1644_v19 }
 0x185   : > { %2392 = vmatmul.bf16.gmra.mxu1 %v3537_v48 }
 0x186   : > { %v1823_v52 = vpack.c.bf16 %v1788_v50, %v1690_v7  ;;  %2441 = vmatmul.bf16.gmra.mxu2 %v3533_v44  ;;  %v3553_v44 = vor.u32 %v3866_v35, %v3550_v36 }
 0x187   : > { %2490 = vmatmul.bf16.gmra.mxu3 %v3537_v48 }
 0x188   : > { %1839 = vst.msk [vmem:[%s4702_s13 + $0xc] sm:$0xf] %vm1134_vm0, %v1823_v52  ;;  %v1936_v54 = vrot.slane %v1823_v52, 4  ;;  %1874 = vrot.lane.b32.xlu1 %v1823_v52, %s4254_s17 }
 0x189   : > { %v1741_v55 = vpop.f32.mrf.mxu2  ;;  %v1645_v61 = vpop.f32.mrf.mxu0 }
 0x18a   : > { %3485 = vst.msk [vmem:[%s4702_s13 + $0x8c] sm:$0xf] %vm1134_vm0, %v1936_v54  ;;  %v1742_v57 = vadd.f32 %v1741_v55, %v4686_v53  ;;  %v1790_v58 = vpop.f32.mrf.mxu3  ;;  %v1184_v59 = vpop.permute.xlu2 %1183  ;;  %v1646_v6 = vadd.f32 %v1645_v61, %v4679_v46 }
 0x18b   : > { %3234 = vst.msk [vmem:[%s4537_s12 + $0x60] sm:$0xf] %vm1134_vm0, %v1184_v59  ;;  %v1289_v60 = vrot.slane %v1184_v59, 4  ;;  %v1694_v63 = vpop.f32.mrf.mxu1 }
 0x18c   : > { %v1791_v62 = vadd.f32 %v1790_v58, %v1742_v57  ;;  %v1695_v16 = vadd.f32 %v1694_v63, %v1646_v6  ;;  %v3556_v63 = vld [vmem:[%s4474_s29 + $0x50] sm:$0xf] }
 0x18d   : > { %3266 = vst.msk [vmem:[%s4537_s12 + $0xe0] sm:$0xf] %vm1134_vm0, %v1289_v60 }
 0x18e   : > { %v1824_v0 = vpack.c.bf16 %v1791_v62, %v1693_v56 }
 0x190   : > { %1840 = vst.msk [vmem:[%s4702_s13 + $0x10] sm:$0xf] %vm1134_vm0, %v1824_v0  ;;  %v1937_v5 = vrot.slane %v1824_v0, 4  ;;  %1876 = vrot.lane.b32.xlu2 %v1824_v0, %s4254_s17  ;;  %v3869_v0 = vld [vmem:[%s4474_s29 + $0x54] sm:$0xf0] }
 0x191   : > { %v1743_v8 = vpop.f32.mrf.mxu2  ;;  %v1648_v15 = vpop.f32.mrf.mxu0  ;;  %v3557_v6 = vor.u32 %v3869_v0, %v3556_v63  ;;  %v3872_v63 = vld [vmem:[%s4474_s29 + $0x74] sm:$0xf]  ;;  %v3574_v0 = vld [vmem:[%s4474_s29 + $0x78] sm:$0xf0] }
 0x192   : > { %3486 = vst.msk [vmem:[%s4702_s13 + $0x90] sm:$0xf] %vm1134_vm0, %v1937_v5  ;;  %v1744_v10 = vadd.f32 %v1743_v8, %v4686_v53  ;;  %v1792_v11 = vpop.f32.mrf.mxu3  ;;  %v1180_v12 = vpop.permute.xlu0 %1179  ;;  %v1649_v21 = vadd.f32 %v1648_v15, %v4679_v46 }
 0x193   : > { %3232 = vst.msk [vmem:[%s4537_s12 + $0x58] sm:$0xf] %vm1134_vm0, %v1180_v12  ;;  %v1287_v14 = vrot.slane %v1180_v12, 4  ;;  %v1697_v18 = vpop.f32.mrf.mxu1 }
 0x194   : > { %v1793_v17 = vadd.f32 %v1792_v11, %v1744_v10  ;;  %2348 = vmatmul.bf16.gmra.mxu0 %v3541_v9  ;;  %v1698_v24 = vadd.f32 %v1697_v18, %v1649_v21  ;;  %v3561_v11 = vor.u32 %v3868_v1, %v3558_v2 }
 0x195   : > { %3264 = vst.msk [vmem:[%s4537_s12 + $0xd8] sm:$0xf] %vm1134_vm0, %v1287_v14  ;;  %2397 = vmatmul.bf16.gmra.mxu1 %v3545_v13 }
 0x196   : > { %v1825_v20 = vpack.c.bf16 %v1793_v17, %v1695_v16  ;;  %2446 = vmatmul.bf16.gmra.mxu2 %v3541_v9 }
 0x197   : > { %2495 = vmatmul.bf16.gmra.mxu3 %v3545_v13 }
 0x198   : > { %1841 = vst.msk [vmem:[%s4702_s13 + $0x14] sm:$0xf] %vm1134_vm0, %v1825_v20  ;;  %v1938_v22 = vrot.slane %v1825_v20, 4  ;;  %1878 = vrot.lane.b32.xlu0 %v1825_v20, %s4254_s17 }
 0x199   : > { %v1746_v23 = vpop.f32.mrf.mxu2  ;;  %v1650_v29 = vpop.f32.mrf.mxu0 }
 0x19a   : > { %3487 = vst.msk [vmem:[%s4702_s13 + $0x94] sm:$0xf] %vm1134_vm0, %v1938_v22  ;;  %v1747_v25 = vadd.f32 %v1746_v23, %v4686_v53  ;;  %v1795_v26 = vpop.f32.mrf.mxu3  ;;  %v1182_v27 = vpop.permute.xlu1 %1181  ;;  %v1651_v38 = vadd.f32 %v1650_v29, %v4679_v46 }
 0x19b   : > { %3233 = vst.msk [vmem:[%s4537_s12 + $0x5c] sm:$0xf] %vm1134_vm0, %v1182_v27  ;;  %v1288_v28 = vrot.slane %v1182_v27, 4  ;;  %v1699_v31 = vpop.f32.mrf.mxu1 }
 0x19c   : > { %v1796_v30 = vadd.f32 %v1795_v26, %v1747_v25  ;;  %v1700_v48 = vadd.f32 %v1699_v31, %v1651_v38  ;;  %v3564_v31 = vld [vmem:[%s4474_s29 + $0x60] sm:$0xf] }
 0x19d   : > { %3265 = vst.msk [vmem:[%s4537_s12 + $0xdc] sm:$0xf] %vm1134_vm0, %v1288_v28 }
 0x19e   : > { %v1826_v32 = vpack.c.bf16 %v1796_v30, %v1698_v24 }
 0x1a0   : > { %1842 = vst.msk [vmem:[%s4702_s13 + $0x18] sm:$0xf] %vm1134_vm0, %v1826_v32  ;;  %v1939_v37 = vrot.slane %v1826_v32, 4  ;;  %1880 = vrot.lane.b32.xlu1 %v1826_v32, %s4254_s17  ;;  %v3871_v32 = vld [vmem:[%s4474_s29 + $0x64] sm:$0xf0] }
 0x1a1   : > { %v1748_v39 = vpop.f32.mrf.mxu2  ;;  %v1653_v47 = vpop.f32.mrf.mxu0  ;;  %v3565_v38 = vor.u32 %v3871_v32, %v3564_v31 }
 0x1a2   : > { %3488 = vst.msk [vmem:[%s4702_s13 + $0x98] sm:$0xf] %vm1134_vm0, %v1939_v37  ;;  %v1749_v41 = vadd.f32 %v1748_v39, %v4686_v53  ;;  %v1797_v42 = vpop.f32.mrf.mxu3  ;;  %v1190_v43 = vpop.permute.xlu2 %1189  ;;  %v1654_v51 = vadd.f32 %v1653_v47, %v4679_v46 }
 0x1a3   : > { %3237 = vst.msk [vmem:[%s4537_s12 + $0x6c] sm:$0xf] %vm1134_vm0, %v1190_v43  ;;  %v1292_v45 = vrot.slane %v1190_v43, 4  ;;  %v1702_v7 = vpop.f32.mrf.mxu1 }
 0x1a4   : > { %v1798_v49 = vadd.f32 %v1797_v42, %v1749_v41  ;;  %2353 = vmatmul.bf16.gmra.mxu0 %v3549_v40  ;;  %v1703_v54 = vadd.f32 %v1702_v7, %v1654_v51  ;;  %v3569_v42 = vor.u32 %v3870_v33, %v3566_v34 }
 0x1a5   : > { %3269 = vst.msk [vmem:[%s4537_s12 + $0xec] sm:$0xf] %vm1134_vm0, %v1292_v45  ;;  %2402 = vmatmul.bf16.gmra.mxu1 %v3553_v44 }
 0x1a6   : > { %v1827_v50 = vpack.c.bf16 %v1798_v49, %v1700_v48  ;;  %2451 = vmatmul.bf16.gmra.mxu2 %v3549_v40 }
 0x1a7   : > { %2500 = vmatmul.bf16.gmra.mxu3 %v3553_v44 }
 0x1a8   : > { %1843 = vst.msk [vmem:[%s4702_s13 + $0x1c] sm:$0xf] %vm1134_vm0, %v1827_v50  ;;  %v1940_v52 = vrot.slane %v1827_v50, 4  ;;  %1882 = vrot.lane.b32.xlu2 %v1827_v50, %s4254_s17 }
 0x1a9   : > { %v1751_v19 = vpop.f32.mrf.mxu2  ;;  %v1655_v59 = vpop.f32.mrf.mxu0 }
 0x1aa   : > { %3489 = vst.msk [vmem:[%s4702_s13 + $0x9c] sm:$0xf] %vm1134_vm0, %v1940_v52  ;;  %v1752_v55 = vadd.f32 %v1751_v19, %v4686_v53  ;;  %v1800_v56 = vpop.f32.mrf.mxu3  ;;  %v1186_v57 = vpop.permute.xlu0 %1185  ;;  %v1656_v4 = vadd.f32 %v1655_v59, %v4679_v46 }
 0x1ab   : > { %3235 = vst.msk [vmem:[%s4537_s12 + $0x64] sm:$0xf] %vm1134_vm0, %v1186_v57  ;;  %v1290_v58 = vrot.slane %v1186_v57, 4  ;;  %v1704_v61 = vpop.f32.mrf.mxu1 }
 0x1ac   : > { %v1801_v60 = vadd.f32 %v1800_v56, %v1752_v55  ;;  %v1705_v14 = vadd.f32 %v1704_v61, %v1656_v4  ;;  %v3572_v61 = vld [vmem:[%s4474_s29 + $0x70] sm:$0xf] }
 0x1ad   : > { %3267 = vst.msk [vmem:[%s4537_s12 + $0xe4] sm:$0xf] %vm1134_vm0, %v1290_v58 }
 0x1ae   : > { %v1828_v62 = vpack.c.bf16 %v1801_v60, %v1703_v54 }
 0x1b0   : > { %1844 = vst.msk [vmem:[%s4702_s13 + $0x20] sm:$0xf] %vm1134_vm0, %v1828_v62  ;;  %v1941_v3 = vrot.slane %v1828_v62, 4  ;;  %1884 = vrot.lane.b32.xlu0 %v1828_v62, %s4254_s17  ;;  %v3873_v62 = vld [vmem:[%s4474_s29 + $0x74] sm:$0xf0] }
 0x1b1   : > { %v1753_v5 = vpop.f32.mrf.mxu2  ;;  %v1658_v13 = vpop.f32.mrf.mxu0  ;;  %v3573_v4 = vor.u32 %v3873_v62, %v3572_v61 }
 0x1b2   : > { %3490 = vst.msk [vmem:[%s4702_s13 + $0xa0] sm:$0xf] %vm1134_vm0, %v1941_v3  ;;  %v1754_v8 = vadd.f32 %v1753_v5, %v4686_v53  ;;  %v1802_v9 = vpop.f32.mrf.mxu3  ;;  %v1188_v10 = vpop.permute.xlu1 %1187  ;;  %v1659_v18 = vadd.f32 %v1658_v13, %v4679_v46 }
 0x1b3   : > { %3236 = vst.msk [vmem:[%s4537_s12 + $0x68] sm:$0xf] %vm1134_vm0, %v1188_v10  ;;  %v1291_v12 = vrot.slane %v1188_v10, 4  ;;  %v1707_v16 = vpop.f32.mrf.mxu1 }
 0x1b4   : > { %v1803_v15 = vadd.f32 %v1802_v9, %v1754_v8  ;;  %2358 = vmatmul.bf16.gmra.mxu0 %v3557_v6  ;;  %v1708_v22 = vadd.f32 %v1707_v16, %v1659_v18  ;;  %v3577_v9 = vor.u32 %v3872_v63, %v3574_v0 }
 0x1b5   : > { %3268 = vst.msk [vmem:[%s4537_s12 + $0xe8] sm:$0xf] %vm1134_vm0, %v1291_v12  ;;  %2407 = vmatmul.bf16.gmra.mxu1 %v3561_v11 }
 0x1b6   : > { %v1829_v17 = vpack.c.bf16 %v1803_v15, %v1705_v14  ;;  %2456 = vmatmul.bf16.gmra.mxu2 %v3557_v6 }
 0x1b7   : > { %2505 = vmatmul.bf16.gmra.mxu3 %v3561_v11 }
 0x1b8   : > { %1845 = vst.msk [vmem:[%s4702_s13 + $0x24] sm:$0xf] %vm1134_vm0, %v1829_v17  ;;  %v1942_v20 = vrot.slane %v1829_v17, 4  ;;  %1886 = vrot.lane.b32.xlu1 %v1829_v17, %s4254_s17 }
 0x1b9   : > { %v1756_v21 = vpop.f32.mrf.mxu2  ;;  %v1660_v27 = vpop.f32.mrf.mxu0 }
 0x1ba   : > { %3491 = vst.msk [vmem:[%s4702_s13 + $0xa4] sm:$0xf] %vm1134_vm0, %v1942_v20  ;;  %v1757_v23 = vadd.f32 %v1756_v21, %v4686_v53  ;;  %v1805_v24 = vpop.f32.mrf.mxu3  ;;  %v1196_v25 = vpop.permute.xlu2 %1195  ;;  %v1661_v36 = vadd.f32 %v1660_v27, %v4679_v46 }
 0x1bb   : > { %3240 = vst.msk [vmem:[%s4537_s12 + $0x78] sm:$0xf] %vm1134_vm0, %v1196_v25  ;;  %v1295_v26 = vrot.slane %v1196_v25, 4  ;;  %v1709_v29 = vpop.f32.mrf.mxu1 }
 0x1bc   : > { %v1806_v28 = vadd.f32 %v1805_v24, %v1757_v23  ;;  %v1710_v45 = vadd.f32 %v1709_v29, %v1661_v36  ;;  %v2079_v29 = vld [vmem:[%s5215_s11] sm:$0x3] }
 0x1bd   : > { %3272 = vst.msk [vmem:[%s4537_s12 + $0xf8] sm:$0xf] %vm1134_vm0, %v1295_v26  ;;  %v4900_v36 = vperm.slane %v2079_v29, 0 }
 0x1be   : > { %v1830_v30 = vpack.c.bf16 %v1806_v28, %v1708_v22 }
 0x1c0   : > { %1846 = vst.msk [vmem:[%s4702_s13 + $0x28] sm:$0xf] %vm1134_vm0, %v1830_v30  ;;  %v1943_v35 = vrot.slane %v1830_v30, 4  ;;  %1888 = vrot.lane.b32.xlu2 %v1830_v30, %s4254_s17 }
 0x1c1   : > { %v1758_v37 = vpop.f32.mrf.mxu2  ;;  %v1663_v44 = vpop.f32.mrf.mxu0 }
 0x1c2   : > { %3492 = vst.msk [vmem:[%s4702_s13 + $0xa8] sm:$0xf] %vm1134_vm0, %v1943_v35  ;;  %v1759_v39 = vadd.f32 %v1758_v37, %v4686_v53  ;;  %v1807_v40 = vpop.f32.mrf.mxu3  ;;  %v1192_v41 = vpop.permute.xlu0 %1191  ;;  %v1664_v7 = vadd.f32 %v1663_v44, %v4679_v46 }
 0x1c3   : > { %3238 = vst.msk [vmem:[%s4537_s12 + $0x70] sm:$0xf] %vm1134_vm0, %v1192_v41  ;;  %v1293_v43 = vrot.slane %v1192_v41, 4  ;;  %v1712_v48 = vpop.f32.mrf.mxu1 }
 0x1c4   : > { %v1808_v47 = vadd.f32 %v1807_v40, %v1759_v39  ;;  %2363 = vmatmul.bf16.gmra.mxu0 %v3565_v38  ;;  %v1713_v52 = vadd.f32 %v1712_v48, %v1664_v7 }
 0x1c5   : > { %3270 = vst.msk [vmem:[%s4537_s12 + $0xf0] sm:$0xf] %vm1134_vm0, %v1293_v43  ;;  %2412 = vmatmul.bf16.gmra.mxu1 %v3569_v42 }
 0x1c6   : > { %v1831_v49 = vpack.c.bf16 %v1808_v47, %v1710_v45  ;;  %2461 = vmatmul.bf16.gmra.mxu2 %v3565_v38 }
 0x1c7   : > { %2510 = vmatmul.bf16.gmra.mxu3 %v3569_v42 }
 0x1c8   : > { %1847 = vst.msk [vmem:[%s4702_s13 + $0x2c] sm:$0xf] %vm1134_vm0, %v1831_v49  ;;  %v1944_v50 = vrot.slane %v1831_v49, 4  ;;  %1890 = vrot.lane.b32.xlu0 %v1831_v49, %s4254_s17 }
 0x1c9   : > { %v1761_v51 = vpop.f32.mrf.mxu2  ;;  %v1665_v57 = vpop.f32.mrf.mxu0 }
 0x1ca   : > { %3493 = vst.msk [vmem:[%s4702_s13 + $0xac] sm:$0xf] %vm1134_vm0, %v1944_v50  ;;  %v1762_v19 = vadd.f32 %v1761_v51, %v4686_v53  ;;  %v1810_v54 = vpop.f32.mrf.mxu3  ;;  %v1194_v55 = vpop.permute.xlu1 %1193  ;;  %v1666_v2 = vadd.f32 %v1665_v57, %v4679_v46 }
 0x1cb   : > { %3239 = vst.msk [vmem:[%s4537_s12 + $0x74] sm:$0xf] %vm1134_vm0, %v1194_v55  ;;  %v1294_v56 = vrot.slane %v1194_v55, 4  ;;  %v1714_v59 = vpop.f32.mrf.mxu1 }
 0x1cc   : > { %v1811_v58 = vadd.f32 %v1810_v54, %v1762_v19  ;;  %v1715_v12 = vadd.f32 %v1714_v59, %v1666_v2 }
 0x1cd   : > { %3271 = vst.msk [vmem:[%s4537_s12 + $0xf4] sm:$0xf] %vm1134_vm0, %v1294_v56 }
 0x1ce   : > { %v1832_v60 = vpack.c.bf16 %v1811_v58, %v1713_v52 }
 0x1d0   : > { %1848 = vst.msk [vmem:[%s4702_s13 + $0x30] sm:$0xf] %vm1134_vm0, %v1832_v60  ;;  %v1945_v1 = vrot.slane %v1832_v60, 4  ;;  %1892 = vrot.lane.b32.xlu1 %v1832_v60, %s4254_s17 }
 0x1d1   : > { %v1763_v3 = vpop.f32.mrf.mxu2  ;;  %v1668_v11 = vpop.f32.mrf.mxu0 }
 0x1d2   : > { %3494 = vst.msk [vmem:[%s4702_s13 + $0xb0] sm:$0xf] %vm1134_vm0, %v1945_v1  ;;  %v1764_v5 = vadd.f32 %v1763_v3, %v4686_v53  ;;  %v1812_v6 = vpop.f32.mrf.mxu3  ;;  %v1871_v8 = vpop.permute.xlu2 %1870  ;;  %v1669_v16 = vadd.f32 %v1668_v11, %v4679_v46 }
 0x1d3   : > { %3467 = vst.msk [vmem:[%s4702_s13 + $0x44] sm:$0xf] %vm1134_vm0, %v1871_v8  ;;  %v1983_v10 = vrot.slane %v1871_v8, 4  ;;  %v1717_v14 = vpop.f32.mrf.mxu1 }
 0x1d4   : > { %v1813_v13 = vadd.f32 %v1812_v6, %v1764_v5  ;;  %2368 = vmatmul.bf16.gmra.mxu0 %v3573_v4  ;;  %v1718_v20 = vadd.f32 %v1717_v14, %v1669_v16 }
 0x1d5   : > { %3499 = vst.msk [vmem:[%s4702_s13 + $0xc4] sm:$0xf] %vm1134_vm0, %v1983_v10  ;;  %2417 = vmatmul.bf16.gmra.mxu1 %v3577_v9 }
 0x1d6   : > { %v1833_v15 = vpack.c.bf16 %v1813_v13, %v1715_v12  ;;  %2466 = vmatmul.bf16.gmra.mxu2 %v3573_v4 }
 0x1d7   : > { %2515 = vmatmul.bf16.gmra.mxu3 %v3577_v9 }
 0x1d8   : > { %1849 = vst.msk [vmem:[%s4702_s13 + $0x34] sm:$0xf] %vm1134_vm0, %v1833_v15  ;;  %v1946_v17 = vrot.slane %v1833_v15, 4  ;;  %1894 = vrot.lane.b32.xlu2 %v1833_v15, %s4254_s17 }
 0x1d9   : > { %v1766_v18 = vpop.f32.mrf.mxu2  ;;  %v1670_v25 = vpop.f32.mrf.mxu0 }
 0x1da   : > { %3495 = vst.msk [vmem:[%s4702_s13 + $0xb4] sm:$0xf] %vm1134_vm0, %v1946_v17  ;;  %v1767_v21 = vadd.f32 %v1766_v18, %v4686_v53  ;;  %v1815_v22 = vpop.f32.mrf.mxu3  ;;  %v1198_v23 = vpop.permute.xlu0 %1197  ;;  %v1671_v31 = vadd.f32 %v1670_v25, %v4679_v46 }
 0x1db   : > { %3241 = vst.msk [vmem:[%s4537_s12 + $0x7c] sm:$0xf] %vm1134_vm0, %v1198_v23  ;;  %v1296_v24 = vrot.slane %v1198_v23, 4  ;;  %v1719_v27 = vpop.f32.mrf.mxu1 }
 0x1dc   : > { %v1816_v26 = vadd.f32 %v1815_v22, %v1767_v21  ;;  %v1720_v39 = vadd.f32 %v1719_v27, %v1671_v31 }
 0x1dd   : > { %3273 = vst.msk [vmem:[%s4537_s12 + $0xfc] sm:$0xf] %vm1134_vm0, %v1296_v24 }
 0x1de   : > { %v1834_v28 = vpack.c.bf16 %v1816_v26, %v1718_v20 }
 0x1e0   : > { %1850 = vst.msk [vmem:[%s4702_s13 + $0x38] sm:$0xf] %vm1134_vm0, %v1834_v28  ;;  %v1947_v30 = vrot.slane %v1834_v28, 4  ;;  %1896 = vrot.lane.b32.xlu0 %v1834_v28, %s4254_s17 }
 0x1e1   : > { %v1768_v32 = vpop.f32.mrf.mxu2  ;;  %v2334_v38 = vpop.f32.mrf.mxu0 }
 0x1e2   : > { %3496 = vst.msk [vmem:[%s4702_s13 + $0xb8] sm:$0xf] %vm1134_vm0, %v1947_v30  ;;  %v1769_v33 = vadd.f32 %v1768_v32, %v4686_v53  ;;  %v1817_v34 = vpop.f32.mrf.mxu3  ;;  %v1869_v35 = vpop.permute.xlu1 %1868  ;;  %v2335_v42 = vadd.f32 %v2334_v38, %v4900_v36  ;;  %v4907_v53 = vperm.slane %v2079_v29, 1 }
 0x1e3   : > { %3466 = vst.msk [vmem:[%s4702_s13 + $0x40] sm:$0xf] %vm1134_vm0, %v1869_v35  ;;  %v1982_v37 = vrot.slane %v1869_v35, 4  ;;  %v2383_v40 = vpop.f32.mrf.mxu1 }
 0x1e4   : > { %v1818_v46 = vadd.f32 %v1817_v34, %v1769_v33  ;;  %v2384_v45 = vadd.f32 %v2383_v40, %v2335_v42 }
 0x1e5   : > { %3498 = vst.msk [vmem:[%s4702_s13 + $0xc0] sm:$0xf] %vm1134_vm0, %v1982_v37 }
 0x1e6   : > { %v1835_v41 = vpack.c.bf16 %v1818_v46, %v1720_v39 }
 0x1e8   : > { %1851 = vst.msk [vmem:[%s4702_s13 + $0x3c] sm:$0xf] %vm1134_vm0, %v1835_v41  ;;  %v1948_v43 = vrot.slane %v1835_v41, 4  ;;  %1898 = vrot.lane.b32.xlu1 %v1835_v41, %s4254_s17 }
 0x1e9   : > { %v2432_v44 = vpop.f32.mrf.mxu2  ;;  %v2336_v50 = vpop.f32.mrf.mxu0 }
 0x1ea   : > { %3497 = vst.msk [vmem:[%s4702_s13 + $0xbc] sm:$0xf] %vm1134_vm0, %v1948_v43  ;;  %v2433_v47 = vadd.f32 %v2432_v44, %v4907_v53  ;;  %v2481_v48 = vpop.f32.mrf.mxu3  ;;  %v1877_v49 = vpop.permute.xlu2 %1876  ;;  %v2337_v55 = vadd.f32 %v2336_v50, %v4900_v36 }
 0x1eb   : > { %3470 = vst.msk [vmem:[%s4702_s13 + $0x50] sm:$0xf] %vm1134_vm0, %v1877_v49  ;;  %v1986_v7 = vrot.slane %v1877_v49, 4  ;;  %v2385_v52 = vpop.f32.mrf.mxu1 }
 0x1ec   : > { %v2482_v51 = vadd.f32 %v2481_v48, %v2433_v47  ;;  %v2386_v62 = vadd.f32 %v2385_v52, %v2337_v55 }
 0x1ed   : > { %3502 = vst.msk [vmem:[%s4702_s13 + $0xd0] sm:$0xf] %vm1134_vm0, %v1986_v7 }
 0x1ee   : > { %v2521_v19 = vpack.c.bf16 %v2482_v51, %v2384_v45 }
 0x1f0   : > { %2537 = vst.msk [vmem:[%s4921_s23] sm:$0xf] %vm1134_vm0, %v2521_v19  ;;  %v2634_v54 = vrot.slane %v2521_v19, 4  ;;  %2569 = vrot.lane.b32.xlu2 %v2521_v19, %s4254_s17 }
 0x1f1   : > { %v2434_v56 = vpop.f32.mrf.mxu2  ;;  %v2339_v61 = vpop.f32.mrf.mxu0 }
 0x1f2   : > { %3722 = vst.msk [vmem:[%s4921_s23 + $0x80] sm:$0xf] %vm1134_vm0, %v2634_v54  ;;  %v2435_v57 = vadd.f32 %v2434_v56, %v4907_v53  ;;  %v2483_v58 = vpop.f32.mrf.mxu3  ;;  %v1873_v59 = vpop.permute.xlu0 %1872  ;;  %v2340_v2 = vadd.f32 %v2339_v61, %v4900_v36 }
 0x1f3   : > { %3468 = vst.msk [vmem:[%s4702_s13 + $0x48] sm:$0xf] %vm1134_vm0, %v1873_v59  ;;  %v1984_v60 = vrot.slane %v1873_v59, 4  ;;  %v2388_v0 = vpop.f32.mrf.mxu1 }
 0x1f4   : > { %v2484_v63 = vadd.f32 %v2483_v58, %v2435_v57  ;;  %v2389_v5 = vadd.f32 %v2388_v0, %v2340_v2 }
 0x1f5   : > { %3500 = vst.msk [vmem:[%s4702_s13 + $0xc8] sm:$0xf] %vm1134_vm0, %v1984_v60 }
 0x1f6   : > { %v2522_v1 = vpack.c.bf16 %v2484_v63, %v2386_v62 }
 0x1f8   : > { %2538 = vst.msk [vmem:[%s4921_s23 + $0x4] sm:$0xf] %vm1134_vm0, %v2522_v1  ;;  %v2635_v3 = vrot.slane %v2522_v1, 4  ;;  %2571 = vrot.lane.b32.xlu0 %v2522_v1, %s4254_s17 }
 0x1f9   : > { %v2437_v4 = vpop.f32.mrf.mxu2  ;;  %v2341_v11 = vpop.f32.mrf.mxu0 }
 0x1fa   : > { %3723 = vst.msk [vmem:[%s4921_s23 + $0x84] sm:$0xf] %vm1134_vm0, %v2635_v3  ;;  %v2438_v6 = vadd.f32 %v2437_v4, %v4907_v53  ;;  %v2486_v8 = vpop.f32.mrf.mxu3  ;;  %v1875_v9 = vpop.permute.xlu1 %1874  ;;  %v2342_v16 = vadd.f32 %v2341_v11, %v4900_v36 }
 0x1fb   : > { %3469 = vst.msk [vmem:[%s4702_s13 + $0x4c] sm:$0xf] %vm1134_vm0, %v1875_v9  ;;  %v1985_v10 = vrot.slane %v1875_v9, 4  ;;  %v2390_v13 = vpop.f32.mrf.mxu1 }
 0x1fc   : > { %v2487_v12 = vadd.f32 %v2486_v8, %v2438_v6  ;;  %v2391_v24 = vadd.f32 %v2390_v13, %v2342_v16 }
 0x1fd   : > { %3501 = vst.msk [vmem:[%s4702_s13 + $0xcc] sm:$0xf] %vm1134_vm0, %v1985_v10 }
 0x1fe   : > { %v2523_v14 = vpack.c.bf16 %v2487_v12, %v2389_v5 }
 0x200   : > { %2539 = vst.msk [vmem:[%s4921_s23 + $0x8] sm:$0xf] %vm1134_vm0, %v2523_v14  ;;  %v2636_v15 = vrot.slane %v2523_v14, 4  ;;  %2573 = vrot.lane.b32.xlu1 %v2523_v14, %s4254_s17 }
 0x201   : > { %v2439_v17 = vpop.f32.mrf.mxu2  ;;  %v2344_v23 = vpop.f32.mrf.mxu0 }
 0x202   : > { %3724 = vst.msk [vmem:[%s4921_s23 + $0x88] sm:$0xf] %vm1134_vm0, %v2636_v15  ;;  %v2440_v18 = vadd.f32 %v2439_v17, %v4907_v53  ;;  %v2488_v20 = vpop.f32.mrf.mxu3  ;;  %v1883_v21 = vpop.permute.xlu2 %1882  ;;  %v2345_v28 = vadd.f32 %v2344_v23, %v4900_v36 }
 0x203   : > { %3473 = vst.msk [vmem:[%s4702_s13 + $0x5c] sm:$0xf] %vm1134_vm0, %v1883_v21  ;;  %v1989_v22 = vrot.slane %v1883_v21, 4  ;;  %v2393_v26 = vpop.f32.mrf.mxu1 }
 0x204   : > { %v2489_v25 = vadd.f32 %v2488_v20, %v2440_v18  ;;  %v2394_v31 = vadd.f32 %v2393_v26, %v2345_v28 }
 0x205   : > { %3505 = vst.msk [vmem:[%s4702_s13 + $0xdc] sm:$0xf] %vm1134_vm0, %v1989_v22 }
 0x206   : > { %v2524_v27 = vpack.c.bf16 %v2489_v25, %v2391_v24 }
 0x208   : > { %2540 = vst.msk [vmem:[%s4921_s23 + $0xc] sm:$0xf] %vm1134_vm0, %v2524_v27  ;;  %v2637_v29 = vrot.slane %v2524_v27, 4  ;;  %2575 = vrot.lane.b32.xlu2 %v2524_v27, %s4254_s17 }
 0x209   : > { %v2442_v30 = vpop.f32.mrf.mxu2  ;;  %v2346_v37 = vpop.f32.mrf.mxu0 }
 0x20a   : > { %3725 = vst.msk [vmem:[%s4921_s23 + $0x8c] sm:$0xf] %vm1134_vm0, %v2637_v29  ;;  %v2443_v32 = vadd.f32 %v2442_v30, %v4907_v53  ;;  %v2491_v33 = vpop.f32.mrf.mxu3  ;;  %v1879_v34 = vpop.permute.xlu0 %1878  ;;  %v2347_v41 = vadd.f32 %v2346_v37, %v4900_v36 }
 0x20b   : > { %3471 = vst.msk [vmem:[%s4702_s13 + $0x54] sm:$0xf] %vm1134_vm0, %v1879_v34  ;;  %v1987_v35 = vrot.slane %v1879_v34, 4  ;;  %v2395_v39 = vpop.f32.mrf.mxu1 }
 0x20c   : > { %v2492_v38 = vadd.f32 %v2491_v33, %v2443_v32  ;;  %v2396_v49 = vadd.f32 %v2395_v39, %v2347_v41 }
 0x20d   : > { %3503 = vst.msk [vmem:[%s4702_s13 + $0xd4] sm:$0xf] %vm1134_vm0, %v1987_v35 }
 0x20e   : > { %v2525_v46 = vpack.c.bf16 %v2492_v38, %v2394_v31 }
 0x210   : > { %2541 = vst.msk [vmem:[%s4921_s23 + $0x10] sm:$0xf] %vm1134_vm0, %v2525_v46  ;;  %v2638_v40 = vrot.slane %v2525_v46, 4  ;;  %2577 = vrot.lane.b32.xlu0 %v2525_v46, %s4254_s17 }
 0x211   : > { %v2444_v42 = vpop.f32.mrf.mxu2  ;;  %v2349_v48 = vpop.f32.mrf.mxu0 }
 0x212   : > { %3726 = vst.msk [vmem:[%s4921_s23 + $0x90] sm:$0xf] %vm1134_vm0, %v2638_v40  ;;  %v2445_v43 = vadd.f32 %v2444_v42, %v4907_v53  ;;  %v2493_v44 = vpop.f32.mrf.mxu3  ;;  %v1881_v45 = vpop.permute.xlu1 %1880  ;;  %v2350_v52 = vadd.f32 %v2349_v48, %v4900_v36 }
 0x213   : > { %3472 = vst.msk [vmem:[%s4702_s13 + $0x58] sm:$0xf] %vm1134_vm0, %v1881_v45  ;;  %v1988_v47 = vrot.slane %v1881_v45, 4  ;;  %v2398_v50 = vpop.f32.mrf.mxu1 }
 0x214   : > { %v2494_v7 = vadd.f32 %v2493_v44, %v2445_v43  ;;  %v2399_v55 = vadd.f32 %v2398_v50, %v2350_v52 }
 0x215   : > { %3504 = vst.msk [vmem:[%s4702_s13 + $0xd8] sm:$0xf] %vm1134_vm0, %v1988_v47 }
 0x216   : > { %v2526_v51 = vpack.c.bf16 %v2494_v7, %v2396_v49 }
 0x218   : > { %2542 = vst.msk [vmem:[%s4921_s23 + $0x14] sm:$0xf] %vm1134_vm0, %v2526_v51  ;;  %v2639_v19 = vrot.slane %v2526_v51, 4  ;;  %2579 = vrot.lane.b32.xlu1 %v2526_v51, %s4254_s17 }
 0x219   : > { %v2447_v54 = vpop.f32.mrf.mxu2  ;;  %v2351_v60 = vpop.f32.mrf.mxu0 }
 0x21a   : > { %3727 = vst.msk [vmem:[%s4921_s23 + $0x94] sm:$0xf] %vm1134_vm0, %v2639_v19  ;;  %v2448_v56 = vadd.f32 %v2447_v54, %v4907_v53  ;;  %v2496_v57 = vpop.f32.mrf.mxu3  ;;  %v1889_v58 = vpop.permute.xlu2 %1888  ;;  %v2352_v1 = vadd.f32 %v2351_v60, %v4900_v36 }
 0x21b   : > { %3476 = vst.msk [vmem:[%s4702_s13 + $0x68] sm:$0xf] %vm1134_vm0, %v1889_v58  ;;  %v1992_v59 = vrot.slane %v1889_v58, 4  ;;  %v2400_v62 = vpop.f32.mrf.mxu1 }
 0x21c   : > { %v2497_v61 = vadd.f32 %v2496_v57, %v2448_v56  ;;  %v2401_v9 = vadd.f32 %v2400_v62, %v2352_v1 }
 0x21d   : > { %3508 = vst.msk [vmem:[%s4702_s13 + $0xe8] sm:$0xf] %vm1134_vm0, %v1992_v59 }
 0x21e   : > { %v2527_v63 = vpack.c.bf16 %v2497_v61, %v2399_v55 }
 0x220   : > { %2543 = vst.msk [vmem:[%s4921_s23 + $0x18] sm:$0xf] %vm1134_vm0, %v2527_v63  ;;  %v2640_v0 = vrot.slane %v2527_v63, 4  ;;  %2581 = vrot.lane.b32.xlu2 %v2527_v63, %s4254_s17 }
 0x221   : > { %v2449_v2 = vpop.f32.mrf.mxu2  ;;  %v2354_v8 = vpop.f32.mrf.mxu0 }
 0x222   : > { %3728 = vst.msk [vmem:[%s4921_s23 + $0x98] sm:$0xf] %vm1134_vm0, %v2640_v0  ;;  %v2450_v3 = vadd.f32 %v2449_v2, %v4907_v53  ;;  %v2498_v4 = vpop.f32.mrf.mxu3  ;;  %v1885_v5 = vpop.permute.xlu0 %1884  ;;  %v2355_v13 = vadd.f32 %v2354_v8, %v4900_v36 }
 0x223   : > { %3474 = vst.msk [vmem:[%s4702_s13 + $0x60] sm:$0xf] %vm1134_vm0, %v1885_v5  ;;  %v1990_v6 = vrot.slane %v1885_v5, 4  ;;  %v2403_v11 = vpop.f32.mrf.mxu1 }
 0x224   : > { %v2499_v10 = vadd.f32 %v2498_v4, %v2450_v3  ;;  %v2404_v16 = vadd.f32 %v2403_v11, %v2355_v13 }
 0x225   : > { %3506 = vst.msk [vmem:[%s4702_s13 + $0xe0] sm:$0xf] %vm1134_vm0, %v1990_v6 }
 0x226   : > { %v2528_v12 = vpack.c.bf16 %v2499_v10, %v2401_v9 }
 0x228   : > { %2544 = vst.msk [vmem:[%s4921_s23 + $0x1c] sm:$0xf] %vm1134_vm0, %v2528_v12  ;;  %v2641_v14 = vrot.slane %v2528_v12, 4  ;;  %2583 = vrot.lane.b32.xlu0 %v2528_v12, %s4254_s17 }
 0x229   : > { %v2452_v15 = vpop.f32.mrf.mxu2  ;;  %v2356_v22 = vpop.f32.mrf.mxu0 }
 0x22a   : > { %3729 = vst.msk [vmem:[%s4921_s23 + $0x9c] sm:$0xf] %vm1134_vm0, %v2641_v14  ;;  %v2453_v17 = vadd.f32 %v2452_v15, %v4907_v53  ;;  %v2501_v18 = vpop.f32.mrf.mxu3  ;;  %v1887_v20 = vpop.permute.xlu1 %1886  ;;  %v2357_v27 = vadd.f32 %v2356_v22, %v4900_v36 }
 0x22b   : > { %3475 = vst.msk [vmem:[%s4702_s13 + $0x64] sm:$0xf] %vm1134_vm0, %v1887_v20  ;;  %v1991_v21 = vrot.slane %v1887_v20, 4  ;;  %v2405_v24 = vpop.f32.mrf.mxu1 }
 0x22c   : > { %v2502_v23 = vadd.f32 %v2501_v18, %v2453_v17  ;;  %v2406_v34 = vadd.f32 %v2405_v24, %v2357_v27 }
 0x22d   : > { %3507 = vst.msk [vmem:[%s4702_s13 + $0xe4] sm:$0xf] %vm1134_vm0, %v1991_v21 }
 0x22e   : > { %v2529_v25 = vpack.c.bf16 %v2502_v23, %v2404_v16 }
 0x230   : > { %2545 = vst.msk [vmem:[%s4921_s23 + $0x20] sm:$0xf] %vm1134_vm0, %v2529_v25  ;;  %v2642_v26 = vrot.slane %v2529_v25, 4  ;;  %2585 = vrot.lane.b32.xlu1 %v2529_v25, %s4254_s17 }
 0x231   : > { %v2454_v28 = vpop.f32.mrf.mxu2  ;;  %v2359_v33 = vpop.f32.mrf.mxu0 }
 0x232   : > { %3730 = vst.msk [vmem:[%s4921_s23 + $0xa0] sm:$0xf] %vm1134_vm0, %v2642_v26  ;;  %v2455_v29 = vadd.f32 %v2454_v28, %v4907_v53  ;;  %v2503_v30 = vpop.f32.mrf.mxu3  ;;  %v1895_v31 = vpop.permute.xlu2 %1894  ;;  %v2360_v39 = vadd.f32 %v2359_v33, %v4900_v36 }
 0x233   : > { %3479 = vst.msk [vmem:[%s4702_s13 + $0x74] sm:$0xf] %vm1134_vm0, %v1895_v31  ;;  %v1995_v32 = vrot.slane %v1895_v31, 4  ;;  %v2408_v37 = vpop.f32.mrf.mxu1 }
 0x234   : > { %v2504_v35 = vadd.f32 %v2503_v30, %v2455_v29  ;;  %v2409_v41 = vadd.f32 %v2408_v37, %v2360_v39 }
 0x235   : > { %3511 = vst.msk [vmem:[%s4702_s13 + $0xf4] sm:$0xf] %vm1134_vm0, %v1995_v32 }
 0x236   : > { %v2530_v38 = vpack.c.bf16 %v2504_v35, %v2406_v34 }
 0x238   : > { %2546 = vst.msk [vmem:[%s4921_s23 + $0x24] sm:$0xf] %vm1134_vm0, %v2530_v38  ;;  %v2643_v46 = vrot.slane %v2530_v38, 4  ;;  %2587 = vrot.lane.b32.xlu2 %v2530_v38, %s4254_s17 }
 0x239   : > { %v2457_v40 = vpop.f32.mrf.mxu2  ;;  %v2361_v47 = vpop.f32.mrf.mxu0 }
 0x23a   : > { %3731 = vst.msk [vmem:[%s4921_s23 + $0xa4] sm:$0xf] %vm1134_vm0, %v2643_v46  ;;  %v2458_v42 = vadd.f32 %v2457_v40, %v4907_v53  ;;  %v2506_v43 = vpop.f32.mrf.mxu3  ;;  %v1891_v44 = vpop.permute.xlu0 %1890  ;;  %v2362_v51 = vadd.f32 %v2361_v47, %v4900_v36 }
 0x23b   : > { %3477 = vst.msk [vmem:[%s4702_s13 + $0x6c] sm:$0xf] %vm1134_vm0, %v1891_v44  ;;  %v1993_v45 = vrot.slane %v1891_v44, 4  ;;  %v2410_v49 = vpop.f32.mrf.mxu1 }
 0x23c   : > { %v2507_v48 = vadd.f32 %v2506_v43, %v2458_v42  ;;  %v2411_v58 = vadd.f32 %v2410_v49, %v2362_v51 }
 0x23d   : > { %3509 = vst.msk [vmem:[%s4702_s13 + $0xec] sm:$0xf] %vm1134_vm0, %v1993_v45 }
 0x23e   : > { %v2531_v7 = vpack.c.bf16 %v2507_v48, %v2409_v41 }
 0x240   : > { %2547 = vst.msk [vmem:[%s4921_s23 + $0x28] sm:$0xf] %vm1134_vm0, %v2531_v7  ;;  %v2644_v50 = vrot.slane %v2531_v7, 4  ;;  %2589 = vrot.lane.b32.xlu0 %v2531_v7, %s4254_s17 }
 0x241   : > { %v2459_v52 = vpop.f32.mrf.mxu2  ;;  %v2364_v57 = vpop.f32.mrf.mxu0 }
 0x242   : > { %3732 = vst.msk [vmem:[%s4921_s23 + $0xa8] sm:$0xf] %vm1134_vm0, %v2644_v50  ;;  %v2460_v19 = vadd.f32 %v2459_v52, %v4907_v53  ;;  %v2508_v54 = vpop.f32.mrf.mxu3  ;;  %v1893_v55 = vpop.permute.xlu1 %1892  ;;  %v2365_v62 = vadd.f32 %v2364_v57, %v4900_v36 }
 0x243   : > { %3478 = vst.msk [vmem:[%s4702_s13 + $0x70] sm:$0xf] %vm1134_vm0, %v1893_v55  ;;  %v1994_v56 = vrot.slane %v1893_v55, 4  ;;  %v2413_v60 = vpop.f32.mrf.mxu1 }
 0x244   : > { %v2509_v59 = vadd.f32 %v2508_v54, %v2460_v19  ;;  %v2414_v1 = vadd.f32 %v2413_v60, %v2365_v62 }
 0x245   : > { %3510 = vst.msk [vmem:[%s4702_s13 + $0xf0] sm:$0xf] %vm1134_vm0, %v1994_v56 }
 0x246   : > { %v2532_v61 = vpack.c.bf16 %v2509_v59, %v2411_v58 }
 0x248   : > { %2548 = vst.msk [vmem:[%s4921_s23 + $0x2c] sm:$0xf] %vm1134_vm0, %v2532_v61  ;;  %v2645_v63 = vrot.slane %v2532_v61, 4  ;;  %2591 = vrot.lane.b32.xlu1 %v2532_v61, %s4254_s17 }
 0x249   : > { %v2462_v0 = vpop.f32.mrf.mxu2  ;;  %v2366_v6 = vpop.f32.mrf.mxu0 }
 0x24a   : > { %3733 = vst.msk [vmem:[%s4921_s23 + $0xac] sm:$0xf] %vm1134_vm0, %v2645_v63  ;;  %v2463_v2 = vadd.f32 %v2462_v0, %v4907_v53  ;;  %v2511_v3 = vpop.f32.mrf.mxu3  ;;  %v2570_v4 = vpop.permute.xlu2 %2569  ;;  %v2367_v12 = vadd.f32 %v2366_v6, %v4900_v36 }
 0x24b   : > { %3706 = vst.msk [vmem:[%s4921_s23 + $0x40] sm:$0xf] %vm1134_vm0, %v2570_v4  ;;  %v2683_v5 = vrot.slane %v2570_v4, 4  ;;  %v2415_v10 = vpop.f32.mrf.mxu1 }
 0x24c   : > { %v2512_v8 = vadd.f32 %v2511_v3, %v2463_v2  ;;  %v2416_v20 = vadd.f32 %v2415_v10, %v2367_v12 }
 0x24d   : > { %3738 = vst.msk [vmem:[%s4921_s23 + $0xc0] sm:$0xf] %vm1134_vm0, %v2683_v5 }
 0x24e   : > { %v2533_v9 = vpack.c.bf16 %v2512_v8, %v2414_v1 }
 0x250   : > { %2549 = vst.msk [vmem:[%s4921_s23 + $0x30] sm:$0xf] %vm1134_vm0, %v2533_v9  ;;  %v2646_v11 = vrot.slane %v2533_v9, 4  ;;  %2593 = vrot.lane.b32.xlu2 %v2533_v9, %s4254_s17 }
 0x251   : > { %v2464_v13 = vpop.f32.mrf.mxu2  ;;  %v2369_v18 = vpop.f32.mrf.mxu0 }
 0x252   : > { %3734 = vst.msk [vmem:[%s4921_s23 + $0xb0] sm:$0xf] %vm1134_vm0, %v2646_v11  ;;  %v2465_v14 = vadd.f32 %v2464_v13, %v4907_v53  ;;  %v2513_v15 = vpop.f32.mrf.mxu3  ;;  %v1897_v16 = vpop.permute.xlu0 %1896  ;;  %v2370_v23 = vadd.f32 %v2369_v18, %v4900_v36 }
 0x253   : > { %3480 = vst.msk [vmem:[%s4702_s13 + $0x78] sm:$0xf] %vm1134_vm0, %v1897_v16  ;;  %v1996_v17 = vrot.slane %v1897_v16, 4  ;;  %v2418_v25 = vpop.f32.mrf.mxu1 }
 0x254   : > { %v2514_v21 = vadd.f32 %v2513_v15, %v2465_v14  ;;  %v2419_v27 = vadd.f32 %v2418_v25, %v2370_v23 }
 0x255   : > { %3512 = vst.msk [vmem:[%s4702_s13 + $0xf8] sm:$0xf] %vm1134_vm0, %v1996_v17 }
 0x256   : > { %v2534_v22 = vpack.c.bf16 %v2514_v21, %v2416_v20 }
 0x258   : > { %2550 = vst.msk [vmem:[%s4921_s23 + $0x34] sm:$0xf] %vm1134_vm0, %v2534_v22  ;;  %v2647_v24 = vrot.slane %v2534_v22, 4  ;;  %2595 = vrot.lane.b32.xlu0 %v2534_v22, %s4254_s17 }
 0x259   : > { %v2467_v26 = vpop.f32.mrf.mxu2  ;;  %v2371_v33 = vpop.f32.mrf.mxu0 }
 0x25a   : > { %3735 = vst.msk [vmem:[%s4921_s23 + $0xb4] sm:$0xf] %vm1134_vm0, %v2647_v24  ;;  %v2468_v28 = vadd.f32 %v2467_v26, %v4907_v53  ;;  %v2516_v29 = vpop.f32.mrf.mxu3  ;;  %v1899_v30 = vpop.permute.xlu1 %1898  ;;  %v2372_v37 = vadd.f32 %v2371_v33, %v4900_v36 }
 0x25b   : > { %3481 = vst.msk [vmem:[%s4702_s13 + $0x7c] sm:$0xf] %vm1134_vm0, %v1899_v30  ;;  %v1997_v31 = vrot.slane %v1899_v30, 4  ;;  %v2420_v40 = vpop.f32.mrf.mxu1 }
 0x25c   : > { %v2517_v32 = vadd.f32 %v2516_v29, %v2468_v28  ;;  %v2421_v43 = vadd.f32 %v2420_v40, %v2372_v37 }
 0x25d   : > { %3513 = vst.msk [vmem:[%s4702_s13 + $0xfc] sm:$0xf] %vm1134_vm0, %v1997_v31 }
 0x25e   : > { %v2535_v34 = vpack.c.bf16 %v2517_v32, %v2419_v27 }
 0x260   : > { %2551 = vst.msk [vmem:[%s4921_s23 + $0x38] sm:$0xf] %vm1134_vm0, %v2535_v34  ;;  %v2648_v35 = vrot.slane %v2535_v34, 4  ;;  %2597 = vrot.lane.b32.xlu1 %v2535_v34, %s4254_s17 }
 0x261   : > { %v2469_v38 = vpop.f32.mrf.mxu2 }
 0x262   : > { %3736 = vst.msk [vmem:[%s4921_s23 + $0xb8] sm:$0xf] %vm1134_vm0, %v2648_v35  ;;  %v2470_v39 = vadd.f32 %v2469_v38, %v4907_v53  ;;  %v2576_v46 = vpop.permute.xlu2 %2575  ;;  %v2518_v41 = vpop.f32.mrf.mxu3 }
 0x263   : > { %3709 = vst.msk [vmem:[%s4921_s23 + $0x4c] sm:$0xf] %vm1134_vm0, %v2576_v46  ;;  %v2686_v42 = vrot.slane %v2576_v46, 4 }
 0x264   : > { %v2519_v36 = vadd.f32 %v2518_v41, %v2470_v39 }
 0x265   : > { %3741 = vst.msk [vmem:[%s4921_s23 + $0xcc] sm:$0xf] %vm1134_vm0, %v2686_v42 }
 0x266   : > { %v2536_v44 = vpack.c.bf16 %v2519_v36, %v2421_v43 }
 0x268   : > { %2552 = vst.msk [vmem:[%s4921_s23 + $0x3c] sm:$0xf] %vm1134_vm0, %v2536_v44  ;;  %v2649_v45 = vrot.slane %v2536_v44, 4  ;;  %2599 = vrot.lane.b32.xlu2 %v2536_v44, %s4254_s17 }
 0x26a   : > { %3737 = vst.msk [vmem:[%s4921_s23 + $0xbc] sm:$0xf] %vm1134_vm0, %v2649_v45  ;;  %v2572_v53 = vpop.permute.xlu0 %2571 }
 0x26b   : > { %3707 = vst.msk [vmem:[%s4921_s23 + $0x44] sm:$0xf] %vm1134_vm0, %v2572_v53  ;;  %v2684_v47 = vrot.slane %v2572_v53, 4 }
 0x26d   : > { %3739 = vst.msk [vmem:[%s4921_s23 + $0xc4] sm:$0xf] %vm1134_vm0, %v2684_v47 }
 0x272   : > { %v2574_v48 = vpop.permute.xlu1 %2573 }
 0x273   : > { %3708 = vst.msk [vmem:[%s4921_s23 + $0x48] sm:$0xf] %vm1134_vm0, %v2574_v48  ;;  %v2685_v49 = vrot.slane %v2574_v48, 4 }
 0x275   : > { %3740 = vst.msk [vmem:[%s4921_s23 + $0xc8] sm:$0xf] %vm1134_vm0, %v2685_v49 }
 0x27a   : > { %v2582_v7 = vpop.permute.xlu2 %2581 }
 0x27b   : > { %3712 = vst.msk [vmem:[%s4921_s23 + $0x58] sm:$0xf] %vm1134_vm0, %v2582_v7  ;;  %v2689_v50 = vrot.slane %v2582_v7, 4 }
 0x27d   : > { %3744 = vst.msk [vmem:[%s4921_s23 + $0xd8] sm:$0xf] %vm1134_vm0, %v2689_v50 }
 0x282   : > { %v2578_v51 = vpop.permute.xlu0 %2577 }
 0x283   : > { %3710 = vst.msk [vmem:[%s4921_s23 + $0x50] sm:$0xf] %vm1134_vm0, %v2578_v51  ;;  %v2687_v52 = vrot.slane %v2578_v51, 4 }
 0x285   : > { %3742 = vst.msk [vmem:[%s4921_s23 + $0xd0] sm:$0xf] %vm1134_vm0, %v2687_v52 }
 0x28a   : > { %v2580_v19 = vpop.permute.xlu1 %2579 }
 0x28b   : > { %3711 = vst.msk [vmem:[%s4921_s23 + $0x54] sm:$0xf] %vm1134_vm0, %v2580_v19  ;;  %v2688_v54 = vrot.slane %v2580_v19, 4 }
 0x28d   : > { %3743 = vst.msk [vmem:[%s4921_s23 + $0xd4] sm:$0xf] %vm1134_vm0, %v2688_v54 }
 0x292   : > { %v2588_v55 = vpop.permute.xlu2 %2587 }
 0x293   : > { %3715 = vst.msk [vmem:[%s4921_s23 + $0x64] sm:$0xf] %vm1134_vm0, %v2588_v55  ;;  %v2692_v56 = vrot.slane %v2588_v55, 4 }
 0x295   : > { %3747 = vst.msk [vmem:[%s4921_s23 + $0xe4] sm:$0xf] %vm1134_vm0, %v2692_v56 }
 0x29a   : > { %v2584_v57 = vpop.permute.xlu0 %2583 }
 0x29b   : > { %3713 = vst.msk [vmem:[%s4921_s23 + $0x5c] sm:$0xf] %vm1134_vm0, %v2584_v57  ;;  %v2690_v58 = vrot.slane %v2584_v57, 4 }
 0x29d   : > { %3745 = vst.msk [vmem:[%s4921_s23 + $0xdc] sm:$0xf] %vm1134_vm0, %v2690_v58 }
 0x2a2   : > { %v2586_v59 = vpop.permute.xlu1 %2585 }
 0x2a3   : > { %3714 = vst.msk [vmem:[%s4921_s23 + $0x60] sm:$0xf] %vm1134_vm0, %v2586_v59  ;;  %v2691_v60 = vrot.slane %v2586_v59, 4 }
 0x2a5   : > { %3746 = vst.msk [vmem:[%s4921_s23 + $0xe0] sm:$0xf] %vm1134_vm0, %v2691_v60 }
 0x2aa   : > { %v2594_v61 = vpop.permute.xlu2 %2593 }
 0x2ab   : > { %3718 = vst.msk [vmem:[%s4921_s23 + $0x70] sm:$0xf] %vm1134_vm0, %v2594_v61  ;;  %v2695_v62 = vrot.slane %v2594_v61, 4 }
 0x2ad   : > { %3750 = vst.msk [vmem:[%s4921_s23 + $0xf0] sm:$0xf] %vm1134_vm0, %v2695_v62 }
 0x2b2   : > { %v2590_v63 = vpop.permute.xlu0 %2589 }
 0x2b3   : > { %3716 = vst.msk [vmem:[%s4921_s23 + $0x68] sm:$0xf] %vm1134_vm0, %v2590_v63  ;;  %v2693_v0 = vrot.slane %v2590_v63, 4 }
 0x2b5   : > { %3748 = vst.msk [vmem:[%s4921_s23 + $0xe8] sm:$0xf] %vm1134_vm0, %v2693_v0 }
 0x2ba   : > { %v2592_v1 = vpop.permute.xlu1 %2591 }
 0x2bb   : > { %3717 = vst.msk [vmem:[%s4921_s23 + $0x6c] sm:$0xf] %vm1134_vm0, %v2592_v1  ;;  %v2694_v2 = vrot.slane %v2592_v1, 4 }
 0x2bd   : > { %3749 = vst.msk [vmem:[%s4921_s23 + $0xec] sm:$0xf] %vm1134_vm0, %v2694_v2 }
 0x2c2   : > { %v2600_v3 = vpop.permute.xlu2 %2599 }
 0x2c3   : > { %3721 = vst.msk [vmem:[%s4921_s23 + $0x7c] sm:$0xf] %vm1134_vm0, %v2600_v3  ;;  %v2698_v4 = vrot.slane %v2600_v3, 4 }
 0x2c5   : > { %3753 = vst.msk [vmem:[%s4921_s23 + $0xfc] sm:$0xf] %vm1134_vm0, %v2698_v4 }
 0x2ca   : > { %v2596_v5 = vpop.permute.xlu0 %2595 }
 0x2cb   : > { %3719 = vst.msk [vmem:[%s4921_s23 + $0x74] sm:$0xf] %vm1134_vm0, %v2596_v5  ;;  %v2696_v6 = vrot.slane %v2596_v5, 4 }
 0x2cd   : > { %3751 = vst.msk [vmem:[%s4921_s23 + $0xf4] sm:$0xf] %vm1134_vm0, %v2696_v6 }
 0x2d2   : > { %v2598_v8 = vpop.permute.xlu1 %2597 }
 0x2d3   : > { %3720 = vst.msk [vmem:[%s4921_s23 + $0x78] sm:$0xf] %vm1134_vm0, %v2598_v8  ;;  %v2697_v9 = vrot.slane %v2598_v8, 4 }
 0x2d5   : > { %3752 = vst.msk [vmem:[%s4921_s23 + $0xf8] sm:$0xf] %vm1134_vm0, %v2697_v9 }
 0x2d6 PF: > { %s30_s22 = sadd.s32 1, %s4247_s22   ;;  %s5217_s5 = sld [smem:[#allocation18_spill]] }
 0x2d7   : > { %p27_p2 = scmp.ge.s32.totalorder %s30_s22, 4   ;;  %s5218_s20 = sld [smem:[#allocation16_spill]] }
 0x2d8   : > { %s5219_s21 = sld [smem:[#allocation17_spill]]  ;;  %s5220_s17 = smov %s4231_s18 }
 0x2d9   : > { %s5221_s18 = smov %s4235_s19  ;;  %29 = sbr.rel (!%p27_p2) target bundleno = 17 (0x11), region = 165 }
 0x2dc   : > { %s5222_s19 = smov %s5217_s5 }
 0x2de   :  { %2812 = vsyncpa [#allocation3], 1 }
 0x2df   :  { %2814 = vsyncpa [#allocation3 + $0x1], 1 }
 0x2e0   :  { %2815 = vsyncpa [#allocation5], 1 }
 0x2e1   :  { %2817 = vsyncpa [#allocation5 + $0x1], 1 }
 0x2e2   :  { %2818 = vsyncpa [#allocation8], 1 }
 0x2e3   :  { %2819 = vsyncpa [#allocation11], 1 }

</bundles_post_ra>
